<compile_context>
chip_gen: v6e
topology: v6e:2x2x1
jax: 0.10.0
libtpu: 0.0.40
codegen_flags: <defaults>
</compile_context>

<pallas_src>
import jax
import jax.numpy as jnp
from jax import lax
from jax.experimental import pallas as pl
from jax.experimental.pallas import tpu as pltpu


# ---------------------------------------------------------------------------
# Hardware model (queried once; conservative fallbacks if the query fails).
# ---------------------------------------------------------------------------
def _tpu_memory_model():
    vmem_cap = None
    try:
        info = pltpu.get_tpu_info()
        vmem_cap = int(getattr(info, "vmem_capacity_bytes", 0)) or None
    except Exception:
        vmem_cap = None
    if vmem_cap is None:
        vmem_cap = 64 << 20  # conservative: v7x has 64 MiB/TC (v5e/v6e: 128 MiB)
    num_tc = 1
    try:
        kind = jax.devices()[0].device_kind.lower()
        if "v7" in kind:
            num_tc = 2  # v7x: 2 TensorCores; "parallel" grid axes shard across them
    except Exception:
        pass
    return vmem_cap, num_tc


_VMEM_CAP, _NUM_TC = _tpu_memory_model()
_VMEM_BUDGET = int(_VMEM_CAP * 0.62)      # pipeline-buffer budget (~40 MiB v7x, ~80 MiB v5e/v6e)
_VMEM_LIMIT_CAP = int(_VMEM_CAP * 0.875)  # never request more scoped VMEM than physically safe

# Flipped to False the first time pipeline_mode=pl.Buffered(1) is rejected.
_SINGLE_BUFFER_WEIGHTS_OK = True


# ---------------------------------------------------------------------------
# Kernels
# ---------------------------------------------------------------------------
def _make_fused_kernel(compute_dtype):
    """Fused fc1 -> relu -> fc2 -> relu -> fc3 on one batch tile (D fully resident)."""

    def kernel(x_ref, w1_ref, b1_ref, w2_ref, b2_ref, w3_ref, b3_ref, o_ref):
        # NOTE: when B % tb != 0 the last x block reads past the array; those garbage
        # rows only influence their own (out-of-range) output lanes, which the masked
        # writeback of the partial (1, tb) output block drops. Any future change that
        # mixes rows (e.g. a batch reduction) must mask them explicitly.
        x = x_ref[...]                                                  # (tb, D)
        w1 = w1_ref[...]
        if compute_dtype is not None and x.dtype != compute_dtype:
            x = x.astype(compute_dtype)
            w1 = w1.astype(compute_dtype)
        h1 = jnp.dot(x, w1, preferred_element_type=jnp.float32) + b1_ref[...]
        h1 = jnp.maximum(h1, 0.0)                                       # (tb, 64)
        h2 = jnp.dot(h1, w2_ref[...], preferred_element_type=jnp.float32) + b2_ref[...]
        h2 = jnp.maximum(h2, 0.0)                                       # (tb, 32)
        # fc3 as (1, 32) . (tb, 32)^T -> (1, tb): lane-dense row, unmasked stores.
        o_row = lax.dot_general(
            w3_ref[...], h2,
            dimension_numbers=(((1,), (1,)), ((), ())),
            preferred_element_type=jnp.float32,
        ) + b3_ref[...]                                                 # (1, tb)
        o_ref[...] = o_row.astype(o_ref.dtype)

    return kernel


def _make_kblocked_kernel(D, tk, compute_dtype):
    """K-blocked fc1 (grid axis 1 = feature blocks, 'arbitrary'), finalize on last K step."""
    rem = D % tk  # in-bounds columns of the last K block (0 == exact fit)

    def kernel(x_ref, w1_ref, b1_ref, w2_ref, b2_ref, w3_ref, b3_ref, o_ref, acc_ref):
        k = pl.program_id(1)
        nk = pl.num_programs(1)

        @pl.when(k == 0)
        def _():
            acc_ref[...] = jnp.zeros_like(acc_ref)

        xb = x_ref[...]                                                 # (tb, tk)
        w1b = w1_ref[...]                                               # (tk, 64)
        if rem:
            # Last K block extends past D: zero the out-of-range feature columns of x
            # and rows of w1 so garbage (possibly NaN/Inf) never reaches the accumulator.
            limit = jnp.where(k == nk - 1, rem, tk)
            col = lax.broadcasted_iota(jnp.int32, xb.shape, 1)
            row = lax.broadcasted_iota(jnp.int32, w1b.shape, 0)
            xb = jnp.where(col < limit, xb, 0).astype(xb.dtype)
            w1b = jnp.where(row < limit, w1b, 0).astype(w1b.dtype)
        if compute_dtype is not None and xb.dtype != compute_dtype:
            xb = xb.astype(compute_dtype)
            w1b = w1b.astype(compute_dtype)
        acc_ref[...] += jnp.dot(xb, w1b, preferred_element_type=jnp.float32)

        @pl.when(k == nk - 1)
        def _():
            h1 = jnp.maximum(acc_ref[...] + b1_ref[...], 0.0)
            h2 = jnp.maximum(
                jnp.dot(h1, w2_ref[...], preferred_element_type=jnp.float32) + b2_ref[...],
                0.0,
            )
            o_row = lax.dot_general(
                w3_ref[...], h2,
                dimension_numbers=(((1,), (1,)), ((), ())),
                preferred_element_type=jnp.float32,
            ) + b3_ref[...]
            o_ref[...] = o_row.astype(o_ref.dtype)

    return kernel


# ---------------------------------------------------------------------------
# Tiling policy
# ---------------------------------------------------------------------------
def _balance_for_cores(B, tb):
    """On 2-TC chips, prefer >=2 batch steps and an even step count for core balance."""
    if _NUM_TC < 2 or B <= 128:
        return tb
    steps = -(-B // tb)
    if steps >= 2 and steps % 2 == 0:
        return tb
    target = 2 if steps < 2 else steps + 1
    cand = ((-(-B // target) + 127) // 128) * 128
    if 128 <= cand < B and (-(-B // cand)) % 2 == 0:
        return cand
    return tb


def _pick_fused_tile(B, D, H1, H2, H3):
    bpe = 4
    if B <= 128:
        return B
    # Resident weights/biases (worst case: 2 pipeline buffers each).
    weight_bytes = 2 * (D * H1 + H1 + H1 * H2 + H2 + H2 * H3 + H3) * bpe
    avail = max(_VMEM_BUDGET - weight_bytes, 1 << 20)
    per_row = (2 * D + H1 + H2 + 2 * H3) * bpe
    tb_vmem = max(int(avail // per_row), 128)
    # HBM-efficiency target: ~4 MiB of x per grid step (a flat 512-row cap is
    # overhead-dominated for small D; 2-4 MiB tiles reach ~85% of HBM roofline).
    tb_goal = max((4 << 20) // (bpe * max(D, 1)), 128)
    tb = min(tb_vmem, tb_goal)
    tb = max(128, (tb // 128) * 128)
    if tb >= B:
        tb = B  # single full block: best for single-TC chips (v5e/v6e)
    return _balance_for_cores(B, tb)


def _pick_kblocked_tiles(B, D, H1, H2, H3, k_tile=None):
    bpe = 4
    tk = int(k_tile) if k_tile else 2048
    tk = max(128, (tk // 128) * 128)
    tk = min(tk, ((D + 127) // 128) * 128)
    small = 2 * (H1 + H1 * H2 + H2 + H2 * H3 + H3) * bpe
    w1_bytes = 2 * tk * H1 * bpe
    avail = max(_VMEM_BUDGET - small - w1_bytes, 1 << 20)
    per_row = (2 * tk + H1 + 2 * H3) * bpe        # x (dbl-buf) + acc + out row (dbl-buf)
    tb_vmem = max(int(avail // per_row), 128)
    tb_goal = max((4 << 20) // (bpe * tk), 128)   # ~4 MiB x block per grid step
    tb = min(tb_vmem, tb_goal)
    tb = max(128, (tb // 128) * 128)
    if tb >= B:
        tb = B
    return _balance_for_cores(B, tb), tk


def _legalize_batch_tile(B, batch_tile):
    tb = min(int(batch_tile), B)
    if tb < B:
        tb = max(128, (tb // 128) * 128)  # keep lane-dense output blocks legal
    return tb


# ---------------------------------------------------------------------------
# pallas_call wrappers
# ---------------------------------------------------------------------------
def _resident_spec(shape, index_map, single_buffer):
    # Constant-index blocks are DMA'd once; single-buffering reclaims the second
    # pipeline buffer (matters most for w1 against v7x's 64 MiB VMEM).
    if single_buffer:
        return pl.BlockSpec(shape, index_map, pipeline_mode=pl.Buffered(1))
    return pl.BlockSpec(shape, index_map)


def _run_fused(x, w1, b1, w2, b2, w3, b3, *, tb, cost, compute_dtype,
               single_buffer_weights):
    B, D = x.shape
    H1, H2 = w1.shape[1], w2.shape[1]
    H3 = b3.shape[1]
    bpe = x.dtype.itemsize
    nbuf_w = 1 if single_buffer_weights else 2
    est = (nbuf_w * (D * H1 * bpe + 4 * (H1 + H1 * H2 + H2 + H2 * H3 + H3))
           + 2 * tb * D * bpe + 4 * tb * (H1 + H2) + 2 * tb * H3 * 4)
    vmem_limit = int(min(max(est + (8 << 20), 32 << 20), _VMEM_LIMIT_CAP))
    cidx = lambda i: (0, 0)

    return pl.pallas_call(
        _make_fused_kernel(compute_dtype),
        out_shape=jax.ShapeDtypeStruct((1, B), jnp.float32),
        grid_spec=pltpu.PrefetchScalarGridSpec(
            num_scalar_prefetch=0,
            grid=(pl.cdiv(B, tb),),
            in_specs=[
                pl.BlockSpec((tb, D), lambda i: (i, 0)),                  # x (streamed)
                _resident_spec((D, H1), cidx, single_buffer_weights),     # w1
                _resident_spec((1, H1), cidx, single_buffer_weights),     # b1
                _resident_spec((H1, H2), cidx, single_buffer_weights),    # w2
                _resident_spec((1, H2), cidx, single_buffer_weights),     # b2
                _resident_spec((H3, H2), cidx, single_buffer_weights),    # w3 (torch (1,32))
                _resident_spec((1, H3), cidx, single_buffer_weights),     # b3
            ],
            out_specs=pl.BlockSpec((1, tb), lambda i: (0, i)),            # lane-dense row
        ),
        compiler_params=pltpu.CompilerParams(
            dimension_semantics=("parallel",),
            vmem_limit_bytes=vmem_limit,
        ),
        cost_estimate=cost,
    )(x, w1, b1, w2, b2, w3, b3)


def _run_kblocked(x, w1, b1, w2, b2, w3, b3, *, tb, tk, cost, compute_dtype,
                  single_buffer_weights):
    B, D = x.shape
    H1, H2 = w1.shape[1], w2.shape[1]
    H3 = b3.shape[1]
    bpe = x.dtype.itemsize
    nbuf_w = 1 if single_buffer_weights else 2
    est = (2 * tb * tk * bpe + 2 * tk * H1 * bpe
           + nbuf_w * 4 * (H1 + H1 * H2 + H2 + H2 * H3 + H3)
           + 4 * tb * H1 + 2 * tb * H3 * 4)
    vmem_limit = int(min(max(est + (8 << 20), 32 << 20), _VMEM_LIMIT_CAP))
    cidx = lambda i, k: (0, 0)

    return pl.pallas_call(
        _make_kblocked_kernel(D, tk, compute_dtype),
        out_shape=jax.ShapeDtypeStruct((1, B), jnp.float32),
        grid_spec=pltpu.PrefetchScalarGridSpec(
            num_scalar_prefetch=0,
            grid=(pl.cdiv(B, tb), pl.cdiv(D, tk)),
            in_specs=[
                pl.BlockSpec((tb, tk), lambda i, k: (i, k)),              # x K-block
                pl.BlockSpec((tk, H1), lambda i, k: (k, 0)),              # w1 K-block
                _resident_spec((1, H1), cidx, single_buffer_weights),     # b1
                _resident_spec((H1, H2), cidx, single_buffer_weights),    # w2
                _resident_spec((1, H2), cidx, single_buffer_weights),     # b2
                _resident_spec((H3, H2), cidx, single_buffer_weights),    # w3
                _resident_spec((1, H3), cidx, single_buffer_weights),     # b3
            ],
            out_specs=pl.BlockSpec((1, tb), lambda i, k: (0, i)),
            scratch_shapes=[pltpu.VMEM((tb, H1), jnp.float32)],           # fc1 accumulator
        ),
        compiler_params=pltpu.CompilerParams(
            dimension_semantics=("parallel", "arbitrary"),
            vmem_limit_bytes=vmem_limit,
        ),
        cost_estimate=cost,
    )(x, w1, b1, w2, b2, w3, b3)


def _dispatch(run_fn, *args, **kwargs):
    """Try single-buffered resident weights first, fall back if unsupported."""
    global _SINGLE_BUFFER_WEIGHTS_OK
    if _SINGLE_BUFFER_WEIGHTS_OK:
        try:
            return run_fn(*args, single_buffer_weights=True, **kwargs)
        except Exception:
            _SINGLE_BUFFER_WEIGHTS_OK = False
    return run_fn(*args, single_buffer_weights=False, **kwargs)


# ---------------------------------------------------------------------------
# Public forward
# ---------------------------------------------------------------------------
def neural_net_forward(x, params, *, batch_tile=None, k_tile=None,
                       stream_bf16=False, mxu_bf16=False, force_kblocked=False):
    """Forward pass matching torch: relu(fc1(x)) -> relu(fc2) -> fc3.

    stream_bf16: cast x/w1 to bf16 before streaming (~2x HBM win); no longer
                 bit-matches the f32 torch reference — keep off for exact numerics.
    mxu_bf16:    keep f32 in HBM but feed bf16 operands to the fc1 MXU matmul
                 (f32 accumulate). Useful on v7x where f32 MXU throughput can
                 become the bottleneck; off by default for exact f32 semantics.
    """
    B, D = x.shape
    w1, b1 = params["w1"], params["b1"]   # (D, 64),  (1, 64)
    w2, b2 = params["w2"], params["b2"]   # (64, 32), (1, 32)
    w3, b3 = params["w3"], params["b3"]   # (1, 32),  (1, 1)  (torch fc3 layout)
    H1, H2, H3 = w1.shape[1], w2.shape[1], w3.shape[0]

    if stream_bf16:
        x = x.astype(jnp.bfloat16)
        w1 = w1.astype(jnp.bfloat16)
    compute_dtype = jnp.bfloat16 if mxu_bf16 else None

    cost = pl.CostEstimate(
        flops=2 * B * (D * H1 + H1 * H2 + H2 * H3),
        transcendentals=0,
        bytes_accessed=int(x.dtype.itemsize) * B * D
        + 4 * (B * H3 + D * H1 + H1 + H1 * H2 + H2 + H2 * H3 + H3),
    )

    # Fused path keeps w1 and a (tb, D) x tile resident; for large D that blows the
    # VMEM budget even at tb=128, so switch to the K-blocked accumulator kernel,
    # which keeps the batch tile large regardless of D.
    fused_min_bytes = (2 * (D * H1 + H1 + H1 * H2 + H2 + H2 * H3 + H3)
                       + 128 * (2 * D + H1 + H2 + 2 * H3)) * 4
    use_kblocked = force_kblocked or (k_tile is not None) or fused_min_bytes > _VMEM_BUDGET

    if use_kblocked:
        tb, tk = _pick_kblocked_tiles(B, D, H1, H2, H3, k_tile)
        if batch_tile is not None:
            tb = _legalize_batch_tile(B, batch_tile)
        out_row = _dispatch(_run_kblocked, x, w1, b1, w2, b2, w3, b3,
                            tb=tb, tk=tk, cost=cost, compute_dtype=compute_dtype)
    else:
        tb = (_pick_fused_tile(B, D, H1, H2, H3) if batch_tile is None
              else _legalize_batch_tile(B, batch_tile))
        out_row = _dispatch(_run_fused, x, w1, b1, w2, b2, w3, b3,
                            tb=tb, cost=cost, compute_dtype=compute_dtype)

    # (1, B) row-major -> (B, 1): free reshape outside the kernel.
    return out_row.reshape(B, H3)


# ---------------------------------------------------------------------------
# Params / reference / test
# ---------------------------------------------------------------------------
def init_params(key, input_size):
    """Deterministic init mimicking nn.Linear's U(-1/sqrt(fan_in), 1/sqrt(fan_in))."""
    def linear(k, fan_in, fan_out):
        kw, kb = jax.random.split(k)
        bound = 1.0 / jnp.sqrt(fan_in)
        w = jax.random.uniform(kw, (fan_in, fan_out), jnp.float32, -bound, bound)
        b = jax.random.uniform(kb, (1, fan_out), jnp.float32, -bound, bound)
        return w, b

    k1, k2, k3 = jax.random.split(key, 3)
    w1, b1 = linear(k1, input_size, 64)
    w2, b2 = linear(k2, 64, 32)
    w3t, b3 = linear(k3, 32, 1)   # (32, 1)
    w3 = w3t.T                    # (1, 32) = torch fc3.weight layout
    return {"w1": w1, "b1": b1, "w2": w2, "b2": b2, "w3": w3, "b3": b3}


def reference_forward(x, p):
    h1 = jnp.maximum(x @ p["w1"] + p["b1"], 0.0)
    h2 = jnp.maximum(h1 @ p["w2"] + p["b2"], 0.0)
    return h2 @ p["w3"].T + p["b3"]


if __name__ == "__main__":
    key = jax.random.PRNGKey(0)
    k_x1, k_p1, k_x2, k_p2 = jax.random.split(key, 4)

    # Test 1: fused single-pass path (small feature count, D resident).
    batch, input_size = 256, 128
    x = jax.random.normal(k_x1, (batch, input_size), jnp.float32)
    params = init_params(k_p1, input_size)
    out = jax.block_until_ready(neural_net_forward(x, params))
    ref = reference_forward(x, params)
    assert out.shape == (batch, 1)
    assert jnp.allclose(out, ref, atol=1e-4, rtol=1e-4)

    # Test 2: K-blocked fc1 path (large-D accumulator kernel), with a ragged last
    # K block (384 = 256 + 128) and a batch size that is not a multiple of 128.
    batch2, input_size2 = 192, 384
    x2 = jax.random.normal(k_x2, (batch2, input_size2), jnp.float32)
    params2 = init_params(k_p2, input_size2)
    out2 = jax.block_until_ready(
        neural_net_forward(x2, params2, force_kblocked=True, k_tile=256))
    ref2 = reference_forward(x2, params2)
    assert out2.shape == (batch2, 1)
    assert jnp.allclose(out2, ref2, atol=1e-4, rtol=1e-4)

    print("KERNEL_OK")
</pallas_src>

<mosaic_0001>
module attributes {stable_mosaic.version = 11 : i64} {
  func.func @kernel(%arg0: i32, %arg1: memref<256x128xf32, #tpu.memory_space<vmem>>, %arg2: memref<128x64xf32, #tpu.memory_space<vmem>>, %arg3: memref<1x64xf32, #tpu.memory_space<vmem>>, %arg4: memref<64x32xf32, #tpu.memory_space<vmem>>, %arg5: memref<1x32xf32, #tpu.memory_space<vmem>>, %arg6: memref<1x32xf32, #tpu.memory_space<vmem>>, %arg7: memref<1x1xf32, #tpu.memory_space<vmem>>, %arg8: memref<1x256xf32, #tpu.memory_space<vmem>>) attributes {dimension_semantics = [#tpu.dimension_semantics<parallel>], iteration_bounds = array<i64: 1>, scalar_prefetch = 0 : i64, scratch_operands = 0 : i64, tpu.core_type = #tpu.core_type<tc>, window_params = [{transform_indices = @transform_0, window_bounds = array<i64: 256, 128>}, {pipeline_mode = #tpu.pipeline_mode<synchronous>, transform_indices = @transform_1, window_bounds = array<i64: 128, 64>}, {pipeline_mode = #tpu.pipeline_mode<synchronous>, transform_indices = @transform_2, window_bounds = array<i64: 1, 64>}, {pipeline_mode = #tpu.pipeline_mode<synchronous>, transform_indices = @transform_3, window_bounds = array<i64: 64, 32>}, {pipeline_mode = #tpu.pipeline_mode<synchronous>, transform_indices = @transform_4, window_bounds = array<i64: 1, 32>}, {pipeline_mode = #tpu.pipeline_mode<synchronous>, transform_indices = @transform_5, window_bounds = array<i64: 1, 32>}, {pipeline_mode = #tpu.pipeline_mode<synchronous>, transform_indices = @transform_6, window_bounds = array<i64: 1, 1>}, {transform_indices = @transform_7, window_bounds = array<i64: 1, 256>}]} {
    %c0 = arith.constant 0 : index
    %c0_0 = arith.constant 0 : index
    %0 = vector.load %arg1[%c0, %c0_0] : memref<256x128xf32, #tpu.memory_space<vmem>>, vector<256x128xf32>
    %c0_1 = arith.constant 0 : index
    %c0_2 = arith.constant 0 : index
    %1 = vector.load %arg2[%c0_1, %c0_2] : memref<128x64xf32, #tpu.memory_space<vmem>>, vector<128x64xf32>
    %cst = arith.constant dense<0.000000e+00> : vector<256x64xf32>
    %2 = tpu.matmul %0, %1, %cst {dimension_numbers = #tpu.dot_dimension_numbers<[1], [0], [0], [1], [0, 0, 1, 1], [], []>} : vector<256x128xf32>, vector<128x64xf32>, vector<256x64xf32> -> vector<256x64xf32>
    %c0_3 = arith.constant 0 : index
    %c0_4 = arith.constant 0 : index
    %3 = vector.load %arg3[%c0_3, %c0_4] : memref<1x64xf32, #tpu.memory_space<vmem>>, vector<1x64xf32>
    %4 = vector.broadcast %3 : vector<1x64xf32> to vector<256x64xf32>
    %5 = arith.addf %2, %4 : vector<256x64xf32>
    %cst_5 = arith.constant 0.000000e+00 : f32
    %6 = vector.broadcast %cst_5 : f32 to vector<256x64xf32>
    %7 = arith.maximumf %5, %6 : vector<256x64xf32>
    %c0_6 = arith.constant 0 : index
    %c0_7 = arith.constant 0 : index
    %8 = vector.load %arg4[%c0_6, %c0_7] : memref<64x32xf32, #tpu.memory_space<vmem>>, vector<64x32xf32>
    %cst_8 = arith.constant dense<0.000000e+00> : vector<256x32xf32>
    %9 = tpu.matmul %7, %8, %cst_8 {dimension_numbers = #tpu.dot_dimension_numbers<[1], [0], [0], [1], [0, 0, 1, 1], [], []>} : vector<256x64xf32>, vector<64x32xf32>, vector<256x32xf32> -> vector<256x32xf32>
    %c0_9 = arith.constant 0 : index
    %c0_10 = arith.constant 0 : index
    %10 = vector.load %arg5[%c0_9, %c0_10] : memref<1x32xf32, #tpu.memory_space<vmem>>, vector<1x32xf32>
    %11 = vector.broadcast %10 : vector<1x32xf32> to vector<256x32xf32>
    %12 = arith.addf %9, %11 : vector<256x32xf32>
    %cst_11 = arith.constant 0.000000e+00 : f32
    %13 = vector.broadcast %cst_11 : f32 to vector<256x32xf32>
    %14 = arith.maximumf %12, %13 : vector<256x32xf32>
    %c0_12 = arith.constant 0 : index
    %c0_13 = arith.constant 0 : index
    %15 = vector.load %arg6[%c0_12, %c0_13] : memref<1x32xf32, #tpu.memory_space<vmem>>, vector<1x32xf32>
    %cst_14 = arith.constant dense<0.000000e+00> : vector<1x256xf32>
    %16 = tpu.matmul %15, %14, %cst_14 {dimension_numbers = #tpu.dot_dimension_numbers<[1], [1], [0], [0], [0, 0, 1, 0], [], []>} : vector<1x32xf32>, vector<256x32xf32>, vector<1x256xf32> -> vector<1x256xf32>
    %c0_15 = arith.constant 0 : index
    %c0_16 = arith.constant 0 : index
    %17 = vector.load %arg7[%c0_15, %c0_16] : memref<1x1xf32, #tpu.memory_space<vmem>>, vector<1x1xf32>
    %18 = vector.broadcast %17 : vector<1x1xf32> to vector<1x256xf32>
    %19 = arith.addf %16, %18 : vector<1x256xf32>
    %c0_17 = arith.constant 0 : index
    %c0_18 = arith.constant 0 : index
    %20 = vector.load %arg8[%c0_17, %c0_18] : memref<1x256xf32, #tpu.memory_space<vmem>>, vector<1x256xf32>
    tpu.vector_store %arg8[%c0_17, %c0_18], %19 {strides = array<i32>} : memref<1x256xf32, #tpu.memory_space<vmem>>, vector<1x256xf32>,
    return
  }
  func.func @transform_0(%arg0: i32) -> (i32, i32) {
    %c0_i32 = arith.constant 0 : i32
    %c0_i32_0 = arith.constant 0 : i32
    return %arg0, %c0_i32 : i32, i32
  }
  func.func @transform_1(%arg0: i32) -> (i32, i32) {
    %c0_i32 = arith.constant 0 : i32
    %c0_i32_0 = arith.constant 0 : i32
    %c0_i32_1 = arith.constant 0 : i32
    return %c0_i32, %c0_i32_0 : i32, i32
  }
  func.func @transform_2(%arg0: i32) -> (i32, i32) {
    %c0_i32 = arith.constant 0 : i32
    %c0_i32_0 = arith.constant 0 : i32
    %c0_i32_1 = arith.constant 0 : i32
    return %c0_i32, %c0_i32_0 : i32, i32
  }
  func.func @transform_3(%arg0: i32) -> (i32, i32) {
    %c0_i32 = arith.constant 0 : i32
    %c0_i32_0 = arith.constant 0 : i32
    %c0_i32_1 = arith.constant 0 : i32
    return %c0_i32, %c0_i32_0 : i32, i32
  }
  func.func @transform_4(%arg0: i32) -> (i32, i32) {
    %c0_i32 = arith.constant 0 : i32
    %c0_i32_0 = arith.constant 0 : i32
    %c0_i32_1 = arith.constant 0 : i32
    return %c0_i32, %c0_i32_0 : i32, i32
  }
  func.func @transform_5(%arg0: i32) -> (i32, i32) {
    %c0_i32 = arith.constant 0 : i32
    %c0_i32_0 = arith.constant 0 : i32
    %c0_i32_1 = arith.constant 0 : i32
    return %c0_i32, %c0_i32_0 : i32, i32
  }
  func.func @transform_6(%arg0: i32) -> (i32, i32) {
    %c0_i32 = arith.constant 0 : i32
    %c0_i32_0 = arith.constant 0 : i32
    %c0_i32_1 = arith.constant 0 : i32
    return %c0_i32, %c0_i32_0 : i32, i32
  }
  func.func @transform_7(%arg0: i32) -> (i32, i32) {
    %c0_i32 = arith.constant 0 : i32
    %c0_i32_0 = arith.constant 0 : i32
    return %c0_i32, %arg0 : i32, i32
  }
}

module attributes {stable_mosaic.version = 11 : i64} {
  func.func @kernel(%arg0: i32, %arg1: memref<256x128xf32, #tpu.memory_space<vmem>>, %arg2: memref<128x64xf32, #tpu.memory_space<vmem>>, %arg3: memref<1x64xf32, #tpu.memory_space<vmem>>, %arg4: memref<64x32xf32, #tpu.memory_space<vmem>>, %arg5: memref<1x32xf32, #tpu.memory_space<vmem>>, %arg6: memref<1x32xf32, #tpu.memory_space<vmem>>, %arg7: memref<1x1xf32, #tpu.memory_space<vmem>>, %arg8: memref<1x256xf32, #tpu.memory_space<vmem>>) attributes {dimension_semantics = [#tpu.dimension_semantics<parallel>], iteration_bounds = array<i64: 1>, scalar_prefetch = 0 : i64, scratch_operands = 0 : i64, tpu.core_type = #tpu.core_type<tc>, window_params = [{transform_indices = @transform_0, window_bounds = array<i64: 256, 128>}, {pipeline_mode = #tpu.pipeline_mode<synchronous>, transform_indices = @transform_1, window_bounds = array<i64: 128, 64>}, {pipeline_mode = #tpu.pipeline_mode<synchronous>, transform_indices = @transform_2, window_bounds = array<i64: 1, 64>}, {pipeline_mode = #tpu.pipeline_mode<synchronous>, transform_indices = @transform_3, window_bounds = array<i64: 64, 32>}, {pipeline_mode = #tpu.pipeline_mode<synchronous>, transform_indices = @transform_4, window_bounds = array<i64: 1, 32>}, {pipeline_mode = #tpu.pipeline_mode<synchronous>, transform_indices = @transform_5, window_bounds = array<i64: 1, 32>}, {pipeline_mode = #tpu.pipeline_mode<synchronous>, transform_indices = @transform_6, window_bounds = array<i64: 1, 1>}, {transform_indices = @transform_7, window_bounds = array<i64: 1, 256>}]} {
    %c0 = arith.constant 0 : index
    %c0_0 = arith.constant 0 : index
    %0 = vector.load %arg1[%c0, %c0_0] : memref<256x128xf32, #tpu.memory_space<vmem>>, vector<256x128xf32>
    %c0_1 = arith.constant 0 : index
    %c0_2 = arith.constant 0 : index
    %1 = vector.load %arg2[%c0_1, %c0_2] : memref<128x64xf32, #tpu.memory_space<vmem>>, vector<128x64xf32>
    %cst = arith.constant dense<0.000000e+00> : vector<256x64xf32>
    %2 = tpu.matmul %0, %1, %cst {dimension_numbers = #tpu.dot_dimension_numbers<[1], [0], [0], [1], [0, 0, 1, 1], [], []>} : vector<256x128xf32>, vector<128x64xf32>, vector<256x64xf32> -> vector<256x64xf32>
    %c0_3 = arith.constant 0 : index
    %c0_4 = arith.constant 0 : index
    %3 = vector.load %arg3[%c0_3, %c0_4] : memref<1x64xf32, #tpu.memory_space<vmem>>, vector<1x64xf32>
    %4 = vector.broadcast %3 : vector<1x64xf32> to vector<256x64xf32>
    %5 = arith.addf %2, %4 : vector<256x64xf32>
    %cst_5 = arith.constant 0.000000e+00 : f32
    %6 = vector.broadcast %cst_5 : f32 to vector<256x64xf32>
    %7 = arith.maximumf %5, %6 : vector<256x64xf32>
    %c0_6 = arith.constant 0 : index
    %c0_7 = arith.constant 0 : index
    %8 = vector.load %arg4[%c0_6, %c0_7] : memref<64x32xf32, #tpu.memory_space<vmem>>, vector<64x32xf32>
    %cst_8 = arith.constant dense<0.000000e+00> : vector<256x32xf32>
    %9 = tpu.matmul %7, %8, %cst_8 {dimension_numbers = #tpu.dot_dimension_numbers<[1], [0], [0], [1], [0, 0, 1, 1], [], []>} : vector<256x64xf32>, vector<64x32xf32>, vector<256x32xf32> -> vector<256x32xf32>
    %c0_9 = arith.constant 0 : index
    %c0_10 = arith.constant 0 : index
    %10 = vector.load %arg5[%c0_9, %c0_10] : memref<1x32xf32, #tpu.memory_space<vmem>>, vector<1x32xf32>
    %11 = vector.broadcast %10 : vector<1x32xf32> to vector<256x32xf32>
    %12 = arith.addf %9, %11 : vector<256x32xf32>
    %cst_11 = arith.constant 0.000000e+00 : f32
    %13 = vector.broadcast %cst_11 : f32 to vector<256x32xf32>
    %14 = arith.maximumf %12, %13 : vector<256x32xf32>
    %c0_12 = arith.constant 0 : index
    %c0_13 = arith.constant 0 : index
    %15 = vector.load %arg6[%c0_12, %c0_13] : memref<1x32xf32, #tpu.memory_space<vmem>>, vector<1x32xf32>
    %cst_14 = arith.constant dense<0.000000e+00> : vector<1x256xf32>
    %16 = tpu.matmul %15, %14, %cst_14 {dimension_numbers = #tpu.dot_dimension_numbers<[1], [1], [0], [0], [0, 0, 1, 0], [], []>} : vector<1x32xf32>, vector<256x32xf32>, vector<1x256xf32> -> vector<1x256xf32>
    %c0_15 = arith.constant 0 : index
    %c0_16 = arith.constant 0 : index
    %17 = vector.load %arg7[%c0_15, %c0_16] : memref<1x1xf32, #tpu.memory_space<vmem>>, vector<1x1xf32>
    %18 = vector.broadcast %17 : vector<1x1xf32> to vector<1x256xf32>
    %19 = arith.addf %16, %18 : vector<1x256xf32>
    %c0_17 = arith.constant 0 : index
    %c0_18 = arith.constant 0 : index
    %20 = vector.load %arg8[%c0_17, %c0_18] : memref<1x256xf32, #tpu.memory_space<vmem>>, vector<1x256xf32>
    tpu.vector_store %arg8[%c0_17, %c0_18], %19 {strides = array<i32>} : memref<1x256xf32, #tpu.memory_space<vmem>>, vector<1x256xf32>,
    return
  }
  func.func @transform_0(%arg0: i32) -> (i32, i32) {
    %c0_i32 = arith.constant 0 : i32
    %c0_i32_0 = arith.constant 0 : i32
    return %arg0, %c0_i32 : i32, i32
  }
  func.func @transform_1(%arg0: i32) -> (i32, i32) {
    %c0_i32 = arith.constant 0 : i32
    %c0_i32_0 = arith.constant 0 : i32
    %c0_i32_1 = arith.constant 0 : i32
    return %c0_i32, %c0_i32_0 : i32, i32
  }
  func.func @transform_2(%arg0: i32) -> (i32, i32) {
    %c0_i32 = arith.constant 0 : i32
    %c0_i32_0 = arith.constant 0 : i32
    %c0_i32_1 = arith.constant 0 : i32
    return %c0_i32, %c0_i32_0 : i32, i32
  }
  func.func @transform_3(%arg0: i32) -> (i32, i32) {
    %c0_i32 = arith.constant 0 : i32
    %c0_i32_0 = arith.constant 0 : i32
    %c0_i32_1 = arith.constant 0 : i32
    return %c0_i32, %c0_i32_0 : i32, i32
  }
  func.func @transform_4(%arg0: i32) -> (i32, i32) {
    %c0_i32 = arith.constant 0 : i32
    %c0_i32_0 = arith.constant 0 : i32
    %c0_i32_1 = arith.constant 0 : i32
    return %c0_i32, %c0_i32_0 : i32, i32
  }
  func.func @transform_5(%arg0: i32) -> (i32, i32) {
    %c0_i32 = arith.constant 0 : i32
    %c0_i32_0 = arith.constant 0 : i32
    %c0_i32_1 = arith.constant 0 : i32
    return %c0_i32, %c0_i32_0 : i32, i32
  }
  func.func @transform_6(%arg0: i32) -> (i32, i32) {
    %c0_i32 = arith.constant 0 : i32
    %c0_i32_0 = arith.constant 0 : i32
    %c0_i32_1 = arith.constant 0 : i32
    return %c0_i32, %c0_i32_0 : i32, i32
  }
  func.func @transform_7(%arg0: i32) -> (i32, i32) {
    %c0_i32 = arith.constant 0 : i32
    %c0_i32_0 = arith.constant 0 : i32
    return %c0_i32, %arg0 : i32, i32
  }
}

</mosaic_0001>

<bundles_post_ra>
// kernel: tpu_custom_call.1
= control target key start
LH: loop header
LB: loop body
LE: loop exit
PB: predicated region body
PF: predicated region fallthrough
CT: control target
= control target key end

     0   :  { %s1697_s0 = inlined_call_operand.vmem [shape: f32[256,128], index: 0, kind: input, shape index: {}]   ;;  %s1698_s1 = inlined_call_operand.vmem [shape: f32[128,64], index: 1, kind: input, shape index: {}]   ;;  %s1699_s2 = inlined_call_operand.vmem [shape: f32[1,64], index: 2, kind: input, shape index: {}]   ;;  %s1700_s3 = inlined_call_operand.vmem [shape: f32[64,32], index: 3, kind: input, shape index: {}]   ;;  %s1701_s4 = inlined_call_operand.vmem [shape: f32[1,32], index: 4, kind: input, shape index: {}]   ;;  %s1702_s5 = inlined_call_operand.vmem [shape: f32[1,32], index: 5, kind: input, shape index: {}]   ;;  %s1703_s6 = inlined_call_operand.<no memory space> [shape: f32[1,1], index: 6, kind: input, shape index: {}]   ;;  %s1704_s7 = inlined_call_operand.hbm [shape: f32[1,256], index: 7, kind: output, shape index: {}]  }
   0x1   :  { %v12_v0 = vstv %s1703_s6 }
   0x2   :  { %13 = vst [vmem:[#allocation2] sm:$0x1] %v12_v0 }
   0x3   :  { %v76_v1 = vld [vmem:[%s1698_s1 + $0x78] sm:$0xff]  ;;  %v75_v2 = vld [vmem:[%s1698_s1 + $0x70] sm:$0xff]  ;;  %v74_v3 = vld [vmem:[%s1698_s1 + $0x68] sm:$0xff] }
   0x4   :  { %1118 = vmatprep.subr.mxu0 %v76_v1  ;;  %v73_v4 = vld [vmem:[%s1698_s1 + $0x60] sm:$0xff]  ;;  %v72_v6 = vld [vmem:[%s1698_s1 + $0x58] sm:$0xff]  ;;  %v71_v7 = vld [vmem:[%s1698_s1 + $0x50] sm:$0xff] }
   0x5   :  { %1119 = vmatpush3.msra.mxu0 %v76_v1  ;;  %v29_v5 = vld [vmem:[%s1697_s0] sm:$0xff]  ;;  %v70_v8 = vld [vmem:[%s1698_s1 + $0x48] sm:$0xff]  ;;  %v68_v10 = vld [vmem:[%s1698_s1 + $0x38] sm:$0xff] }
   0x6   :  { %1120 = vmatprep.subr.mxu0 %v75_v2  ;;  %1150 = vmatprep.mubr.f32.mxu0 %v29_v5  ;;  %v69_v9 = vld [vmem:[%s1698_s1 + $0x40] sm:$0xff]  ;;  %v67_v11 = vld [vmem:[%s1698_s1 + $0x30] sm:$0xff]  ;;  %v348_v12 = vld [vmem:[%s1700_s3 + $0x38] sm:$0xff] }
   0x7   :  { %1121 = vmatpush3.msra.mxu0 %v75_v2  ;;  %v347_v13 = vld [vmem:[%s1700_s3 + $0x30] sm:$0xff]  ;;  %1198 = vmatprep.subr.mxu1 %v348_v12 }
   0x8   :  { %1122 = vmatprep.subr.mxu0 %v74_v3 }
   0x9   :  { %1123 = vmatpush3.msra.mxu0 %v74_v3 }
   0xa   :  { %1124 = vmatprep.subr.mxu0 %v73_v4 }
   0xb   :  { %1125 = vmatpush3.msra.mxu0 %v73_v4 }
   0xc   :  { %1126 = vmatprep.subr.mxu0 %v72_v6 }
   0xd   :  { %1127 = vmatpush3.msra.mxu0 %v72_v6 }
   0xe   :  { %1128 = vmatprep.subr.mxu0 %v71_v7 }
   0xf   :  { %1129 = vmatpush3.msra.mxu0 %v71_v7 }
  0x10   :  { %1130 = vmatprep.subr.mxu0 %v70_v8 }
  0x11   :  { %1131 = vmatpush3.msra.mxu0 %v70_v8 }
  0x12   :  { %1132 = vmatprep.subr.mxu0 %v69_v9 }
  0x13   :  { %1133 = vmatpush3.msra.mxu0 %v69_v9 }
  0x14   :  { %1134 = vmatprep.subr.mxu0 %v68_v10 }
  0x15   :  { %14 = vsyncpa [#allocation4], 0  ;;  %1135 = vmatpush3.msra.mxu0 %v68_v10  ;;  %v66_v14 = vld [vmem:[%s1698_s1 + $0x28] sm:$0xff]  ;;  %1199 = vmatpush3.msra.mxu1 %v348_v12  ;;  %v65_v16 = vld [vmem:[%s1698_s1 + $0x20] sm:$0xff]  ;;  %vm356_vm0 = vcmask 523264   ;;  %vm721_vm1 = vcmask 261120  }
  0x16   :  { %v346_v15 = vld [vmem:[%s1700_s3 + $0x28] sm:$0xff]  ;;  %1136 = vmatprep.subr.mxu0 %v67_v11  ;;  %1200 = vmatprep.subr.mxu1 %v347_v13  ;;  %v345_v17 = vld [vmem:[%s1700_s3 + $0x20] sm:$0xff]  ;;  %v64_v18 = vld [vmem:[%s1698_s1 + $0x18] sm:$0xff] }
  0x17   :  { %1137 = vmatpush3.msra.mxu0 %v67_v11  ;;  %1201 = vmatpush3.msra.mxu1 %v347_v13  ;;  %v63_v19 = vld [vmem:[%s1698_s1 + $0x10] sm:$0xff]  ;;  %v62_v20 = vld [vmem:[%s1698_s1 + $0x8] sm:$0xff]  ;;  %v61_v21 = vld [vmem:[%s1698_s1] sm:$0xff] }
  0x18   :  { %1138 = vmatprep.subr.mxu0 %v66_v14  ;;  %1202 = vmatprep.subr.mxu1 %v346_v15  ;;  %v30_v22 = vld [vmem:[%s1697_s0 + $0x8] sm:$0xff]  ;;  %v31_v23 = vld [vmem:[%s1697_s0 + $0x10] sm:$0xff]  ;;  %v32_v24 = vld [vmem:[%s1697_s0 + $0x18] sm:$0xff] }
  0x19   :  { %1139 = vmatpush3.msra.mxu0 %v66_v14  ;;  %1203 = vmatpush3.msra.mxu1 %v346_v15  ;;  %v33_v25 = vld [vmem:[%s1697_s0 + $0x20] sm:$0xff]  ;;  %v34_v26 = vld [vmem:[%s1697_s0 + $0x28] sm:$0xff]  ;;  %v35_v27 = vld [vmem:[%s1697_s0 + $0x30] sm:$0xff] }
  0x1a   :  { %1140 = vmatprep.subr.mxu0 %v65_v16  ;;  %1204 = vmatprep.subr.mxu1 %v345_v17  ;;  %v36_v28 = vld [vmem:[%s1697_s0 + $0x38] sm:$0xff]  ;;  %v37_v29 = vld [vmem:[%s1697_s0 + $0x40] sm:$0xff]  ;;  %v38_v30 = vld [vmem:[%s1697_s0 + $0x48] sm:$0xff] }
  0x1b   :  { %1141 = vmatpush3.msra.mxu0 %v65_v16  ;;  %1205 = vmatpush3.msra.mxu1 %v345_v17  ;;  %v39_v31 = vld [vmem:[%s1697_s0 + $0x50] sm:$0xff]  ;;  %v40_v32 = vld [vmem:[%s1697_s0 + $0x58] sm:$0xff]  ;;  %v41_v33 = vld [vmem:[%s1697_s0 + $0x60] sm:$0xff] }
  0x1c   :  { %1142 = vmatprep.subr.mxu0 %v64_v18  ;;  %v42_v34 = vld [vmem:[%s1697_s0 + $0x68] sm:$0xff]  ;;  %v43_v35 = vld [vmem:[%s1697_s0 + $0x70] sm:$0xff]  ;;  %v44_v36 = vld [vmem:[%s1697_s0 + $0x78] sm:$0xff] }
  0x1d   :  { %1143 = vmatpush3.msra.mxu0 %v64_v18  ;;  %v45_v37 = vld [vmem:[%s1697_s0 + $0x80] sm:$0xff]  ;;  %v46_v38 = vld [vmem:[%s1697_s0 + $0x88] sm:$0xff]  ;;  %v47_v39 = vld [vmem:[%s1697_s0 + $0x90] sm:$0xff] }
  0x1e   :  { %1144 = vmatprep.subr.mxu0 %v63_v19  ;;  %v48_v40 = vld [vmem:[%s1697_s0 + $0x98] sm:$0xff]  ;;  %v49_v41 = vld [vmem:[%s1697_s0 + $0xa0] sm:$0xff]  ;;  %v50_v42 = vld [vmem:[%s1697_s0 + $0xa8] sm:$0xff] }
  0x1f   :  { %1145 = vmatpush3.msra.mxu0 %v63_v19  ;;  %v51_v43 = vld [vmem:[%s1697_s0 + $0xb0] sm:$0xff]  ;;  %v52_v44 = vld [vmem:[%s1697_s0 + $0xb8] sm:$0xff]  ;;  %v53_v45 = vld [vmem:[%s1697_s0 + $0xc0] sm:$0xff] }
  0x20   :  { %1146 = vmatprep.subr.mxu0 %v62_v20  ;;  %v54_v46 = vld [vmem:[%s1697_s0 + $0xc8] sm:$0xff]  ;;  %v55_v47 = vld [vmem:[%s1697_s0 + $0xd0] sm:$0xff]  ;;  %v56_v48 = vld [vmem:[%s1697_s0 + $0xd8] sm:$0xff] }
  0x21   :  { %1147 = vmatpush3.msra.mxu0 %v62_v20  ;;  %v57_v49 = vld [vmem:[%s1697_s0 + $0xe0] sm:$0xff]  ;;  %v58_v50 = vld [vmem:[%s1697_s0 + $0xe8] sm:$0xff]  ;;  %v59_v51 = vld [vmem:[%s1697_s0 + $0xf0] sm:$0xff] }
  0x22   :  { %1148 = vmatprep.subr.mxu0 %v61_v21  ;;  %v60_v52 = vld [vmem:[%s1697_s0 + $0xf8] sm:$0xff]  ;;  %v343_v54 = vld [vmem:[%s1700_s3 + $0x10] sm:$0xff]  ;;  %v342_v55 = vld [vmem:[%s1700_s3 + $0x8] sm:$0xff] }
  0x23   :  { %1149 = vmatpush3.msra.mxu0 %v61_v21  ;;  %v344_v53 = vld [vmem:[%s1700_s3 + $0x18] sm:$0xff]  ;;  %v341_v56 = vld [vmem:[%s1700_s3] sm:$0xff] }
  0x24   :  { %1151 = vmatmul.mubr.f32.vlgmr.msra.gmra.mxu0 %v30_v22  ;;  %1206 = vmatprep.subr.mxu1 %v344_v53  ;;  %v1505_v57 = vld [vmem:[%s1699_s2] ss:$0 sm:$0xff] }
  0x25   :  { %1153 = vmatprep.mubr.f32.mxu0 %v31_v23  ;;  %1207 = vmatpush3.msra.mxu1 %v344_v53 }
  0x26   :  { %1208 = vmatprep.subr.mxu1 %v343_v54 }
  0x27   :  { %1209 = vmatpush3.msra.mxu1 %v343_v54 }
  0x28   :  { %1154 = vmatmul.mubr.f32.gmra.mxu0 %v32_v24  ;;  %1210 = vmatprep.subr.mxu1 %v342_v55 }
  0x29   :  { %1156 = vmatprep.mubr.f32.mxu0 %v33_v25  ;;  %1211 = vmatpush3.msra.mxu1 %v342_v55 }
  0x2a   :  { %1212 = vmatprep.subr.mxu1 %v341_v56 }
  0x2b   :  { %1213 = vmatpush3.msra.mxu1 %v341_v56 }
  0x2c   :  { %1157 = vmatmul.mubr.f32.gmra.mxu0 %v34_v26 }
  0x2d   :  { %1159 = vmatprep.mubr.f32.mxu0 %v35_v27 }
  0x30   :  { %1160 = vmatmul.mubr.f32.gmra.mxu0 %v36_v28 }
  0x31   :  { %1162 = vmatprep.mubr.f32.mxu0 %v37_v29 }
  0x34   :  { %1163 = vmatmul.mubr.f32.gmra.mxu0 %v38_v30 }
  0x35   :  { %1165 = vmatprep.mubr.f32.mxu0 %v39_v31 }
  0x38   :  { %1166 = vmatmul.mubr.f32.gmra.mxu0 %v40_v32 }
  0x39   :  { %1168 = vmatprep.mubr.f32.mxu0 %v41_v33 }
  0x3c   :  { %1169 = vmatmul.mubr.f32.gmra.mxu0 %v42_v34 }
  0x3d   :  { %1171 = vmatprep.mubr.f32.mxu0 %v43_v35 }
  0x40   :  { %1172 = vmatmul.mubr.f32.gmra.mxu0 %v44_v36 }
  0x41   :  { %1174 = vmatprep.mubr.f32.mxu0 %v45_v37 }
  0x44   :  { %1175 = vmatmul.mubr.f32.gmra.mxu0 %v46_v38 }
  0x45   :  { %1177 = vmatprep.mubr.f32.mxu0 %v47_v39 }
  0x48   :  { %1178 = vmatmul.mubr.f32.gmra.mxu0 %v48_v40 }
  0x49   :  { %1180 = vmatprep.mubr.f32.mxu0 %v49_v41 }
  0x4c   :  { %1181 = vmatmul.mubr.f32.gmra.mxu0 %v50_v42 }
  0x4d   :  { %1183 = vmatprep.mubr.f32.mxu0 %v51_v43 }
  0x50   :  { %1184 = vmatmul.mubr.f32.gmra.mxu0 %v52_v44 }
  0x51   :  { %1186 = vmatprep.mubr.f32.mxu0 %v53_v45 }
  0x54   :  { %1187 = vmatmul.mubr.f32.gmra.mxu0 %v54_v46 }
  0x55   :  { %1189 = vmatprep.mubr.f32.mxu0 %v55_v47 }
  0x58   :  { %1190 = vmatmul.mubr.f32.gmra.mxu0 %v56_v48 }
  0x59   :  { %1192 = vmatprep.mubr.f32.mxu0 %v57_v49 }
  0x5c   :  { %1193 = vmatmul.mubr.f32.gmra.mxu0 %v58_v50 }
  0x5d   :  { %1195 = vmatprep.mubr.f32.mxu0 %v59_v51 }
  0x60   :  { %1196 = vmatmul.mubr.f32.gmra.mxu0 %v60_v52 }
  0xe4   :  { %v1152_v58 = vpop.f32.mrf.mxu0 }
  0xe5   :  { %v156_v59 = vadd.f32 %v1152_v58, %v1505_v57 }
  0xe6   :  { %v150_v60 = vpop.f32.mrf.mxu0 }
  0xe7   :  { %v151_v61 = vadd.f32 %v1505_v57, %v150_v60  ;;  %v310_v0 = vmax.f32 %v156_v59, 0.0 }
  0xe8   :  { %v1155_v62 = vpop.f32.mrf.mxu0 }
  0xe9   :  { %v309_v63 = vmax.f32 %v151_v61, 0.0  ;;  %v166_v1 = vadd.f32 %v1155_v62, %v1505_v57 }
  0xea   :  { %v160_v2 = vpop.f32.mrf.mxu0 }
  0xeb   :  { %v161_v3 = vadd.f32 %v1505_v57, %v160_v2  ;;  %1214 = vmatprep.mubr.msk.f32.mxu1 %vm356_vm0, %v309_v63  ;;  %v312_v6 = vmax.f32 %v166_v1, 0.0 }
  0xec   :  { %v1158_v4 = vpop.f32.mrf.mxu0  ;;  %1215 = vmatmul.mubr.msk.f32.vlgmr.msra.gmra.mxu1 %vm356_vm0, %v310_v0 }
  0xed   :  { %v311_v5 = vmax.f32 %v161_v3, 0.0  ;;  %v176_v7 = vadd.f32 %v1158_v4, %v1505_v57 }
  0xee   :  { %v170_v8 = vpop.f32.mrf.mxu0 }
  0xef   :  { %v171_v9 = vadd.f32 %v1505_v57, %v170_v8  ;;  %1217 = vmatprep.mubr.msk.f32.mxu1 %vm356_vm0, %v311_v5  ;;  %v314_v12 = vmax.f32 %v176_v7, 0.0 }
  0xf0   :  { %v1161_v10 = vpop.f32.mrf.mxu0  ;;  %1218 = vmatmul.mubr.msk.f32.gmra.mxu1 %vm356_vm0, %v312_v6 }
  0xf1   :  { %v313_v11 = vmax.f32 %v171_v9, 0.0  ;;  %v186_v13 = vadd.f32 %v1161_v10, %v1505_v57 }
  0xf2   :  { %v180_v14 = vpop.f32.mrf.mxu0 }
  0xf3   :  { %v181_v15 = vadd.f32 %v1505_v57, %v180_v14  ;;  %1220 = vmatprep.mubr.msk.f32.mxu1 %vm356_vm0, %v313_v11  ;;  %v316_v18 = vmax.f32 %v186_v13, 0.0 }
  0xf4   :  { %v1164_v16 = vpop.f32.mrf.mxu0  ;;  %1221 = vmatmul.mubr.msk.f32.gmra.mxu1 %vm356_vm0, %v314_v12 }
  0xf5   :  { %v315_v17 = vmax.f32 %v181_v15, 0.0  ;;  %v196_v19 = vadd.f32 %v1164_v16, %v1505_v57 }
  0xf6   :  { %v190_v20 = vpop.f32.mrf.mxu0 }
  0xf7   :  { %v191_v21 = vadd.f32 %v1505_v57, %v190_v20  ;;  %1223 = vmatprep.mubr.msk.f32.mxu1 %vm356_vm0, %v315_v17  ;;  %v318_v24 = vmax.f32 %v196_v19, 0.0 }
  0xf8   :  { %v1167_v22 = vpop.f32.mrf.mxu0  ;;  %1224 = vmatmul.mubr.msk.f32.gmra.mxu1 %vm356_vm0, %v316_v18 }
  0xf9   :  { %v317_v23 = vmax.f32 %v191_v21, 0.0  ;;  %v206_v25 = vadd.f32 %v1167_v22, %v1505_v57 }
  0xfa   :  { %v200_v26 = vpop.f32.mrf.mxu0 }
  0xfb   :  { %v201_v27 = vadd.f32 %v1505_v57, %v200_v26  ;;  %1226 = vmatprep.mubr.msk.f32.mxu1 %vm356_vm0, %v317_v23  ;;  %v320_v30 = vmax.f32 %v206_v25, 0.0 }
  0xfc   :  { %v1170_v28 = vpop.f32.mrf.mxu0  ;;  %1227 = vmatmul.mubr.msk.f32.gmra.mxu1 %vm356_vm0, %v318_v24 }
  0xfd   :  { %v319_v29 = vmax.f32 %v201_v27, 0.0  ;;  %v216_v31 = vadd.f32 %v1170_v28, %v1505_v57  ;;  %v1574_v27 = vld [vmem:[%s1702_s5] sm:$0x1] }
  0xfe   :  { %v210_v32 = vpop.f32.mrf.mxu0  ;;  %v711_v28 = vld [vmem:[#allocation2] sm:$0x1] }
  0xff   :  { %v211_v33 = vadd.f32 %v1505_v57, %v210_v32  ;;  %1229 = vmatprep.mubr.msk.f32.mxu1 %vm356_vm0, %v319_v29  ;;  %v322_v36 = vmax.f32 %v216_v31, 0.0 }
 0x100   :  { %v1173_v34 = vpop.f32.mrf.mxu0  ;;  %1230 = vmatmul.mubr.msk.f32.gmra.mxu1 %vm356_vm0, %v320_v30  ;;  %v1288_v30 = vmov 0  }
 0x101   :  { %v321_v35 = vmax.f32 %v211_v33, 0.0  ;;  %v226_v37 = vadd.f32 %v1173_v34, %v1505_v57  ;;  %1265 = vset.pattern.permute.xlu0 %v1288_v30 }
 0x102   :  { %v220_v38 = vpop.f32.mrf.mxu0  ;;  %714 = vperm.xlu0 %1265, %v711_v28  }
 0x103   :  { %v221_v39 = vadd.f32 %v1505_v57, %v220_v38  ;;  %1232 = vmatprep.mubr.msk.f32.mxu1 %vm356_vm0, %v321_v35  ;;  %v324_v42 = vmax.f32 %v226_v37, 0.0 }
 0x104   :  { %v1176_v40 = vpop.f32.mrf.mxu0  ;;  %1233 = vmatmul.mubr.msk.f32.gmra.mxu1 %vm356_vm0, %v322_v36 }
 0x105   :  { %v323_v41 = vmax.f32 %v221_v39, 0.0  ;;  %v236_v43 = vadd.f32 %v1176_v40, %v1505_v57 }
 0x106   :  { %v230_v44 = vpop.f32.mrf.mxu0 }
 0x107   :  { %v231_v45 = vadd.f32 %v1505_v57, %v230_v44  ;;  %1235 = vmatprep.mubr.msk.f32.mxu1 %vm356_vm0, %v323_v41  ;;  %v326_v48 = vmax.f32 %v236_v43, 0.0 }
 0x108   :  { %v1179_v46 = vpop.f32.mrf.mxu0  ;;  %1236 = vmatmul.mubr.msk.f32.gmra.mxu1 %vm356_vm0, %v324_v42 }
 0x109   :  { %v325_v47 = vmax.f32 %v231_v45, 0.0  ;;  %v246_v49 = vadd.f32 %v1179_v46, %v1505_v57 }
 0x10a   :  { %v240_v50 = vpop.f32.mrf.mxu0 }
 0x10b   :  { %v241_v51 = vadd.f32 %v1505_v57, %v240_v50  ;;  %1238 = vmatprep.mubr.msk.f32.mxu1 %vm356_vm0, %v325_v47  ;;  %v328_v54 = vmax.f32 %v246_v49, 0.0 }
 0x10c   :  { %v1182_v52 = vpop.f32.mrf.mxu0  ;;  %1239 = vmatmul.mubr.msk.f32.gmra.mxu1 %vm356_vm0, %v326_v48 }
 0x10d   :  { %v327_v53 = vmax.f32 %v241_v51, 0.0  ;;  %v256_v55 = vadd.f32 %v1182_v52, %v1505_v57 }
 0x10e   :  { %v250_v56 = vpop.f32.mrf.mxu0 }
 0x10f   :  { %v251_v58 = vadd.f32 %v1505_v57, %v250_v56  ;;  %1241 = vmatprep.mubr.msk.f32.mxu1 %vm356_vm0, %v327_v53  ;;  %v330_v61 = vmax.f32 %v256_v55, 0.0 }
 0x110   :  { %v1185_v59 = vpop.f32.mrf.mxu0  ;;  %1242 = vmatmul.mubr.msk.f32.gmra.mxu1 %vm356_vm0, %v328_v54 }
 0x111   :  { %v329_v60 = vmax.f32 %v251_v58, 0.0  ;;  %v266_v62 = vadd.f32 %v1185_v59, %v1505_v57 }
 0x112   :  { %v260_v63 = vpop.f32.mrf.mxu0 }
 0x113   :  { %v261_v0 = vadd.f32 %v1505_v57, %v260_v63  ;;  %1244 = vmatprep.mubr.msk.f32.mxu1 %vm356_vm0, %v329_v60  ;;  %v332_v3 = vmax.f32 %v266_v62, 0.0  ;;  %v1611_v60 = vld [vmem:[%s1701_s4] ss:$0 sm:$0xff]  ;;  %s1290_s4 = smov [#allocation3]  }
 0x114   :  { %v1188_v1 = vpop.f32.mrf.mxu0  ;;  %1245 = vmatmul.mubr.msk.f32.gmra.mxu1 %vm356_vm0, %v330_v61  ;;  %s921_s17 = sshll.u32 %s1290_s4, 4  ;;  %s922_s17 = int_to_ptr.vmem [resolvable:$true] %s921_s17 }
 0x115   :  { %v331_v2 = vmax.f32 %v261_v0, 0.0  ;;  %v276_v4 = vadd.f32 %v1188_v1, %v1505_v57  ;;  %s1266_s18 = scalar_lea.vmem %s922_s17, 32  ;;  %p1271_p1 = scmp.lt.s32.totalorder %s922_s17, %s922_s17 }
 0x116   :  { %v270_v5 = vpop.f32.mrf.mxu0  ;;  %p1267_p0 = scmp.ne.s32.totalorder %s922_s17, %s1266_s18  ;;  %p1272_p2 = scmp.lt.s32.totalorder %s1266_s18, %s1266_s18 }
 0x117   :  { %v271_v6 = vadd.f32 %v1505_v57, %v270_v5  ;;  %1247 = vmatprep.mubr.msk.f32.mxu1 %vm356_vm0, %v331_v2  ;;  %v334_v9 = vmax.f32 %v276_v4, 0.0 }
 0x118   :  { %v1191_v7 = vpop.f32.mrf.mxu0  ;;  %1248 = vmatmul.mubr.msk.f32.gmra.mxu1 %vm356_vm0, %v332_v3  ;;  %p1273_p3 = por %p1272_p2, %p1271_p1 }
 0x119   :  { %v333_v8 = vmax.f32 %v271_v6, 0.0  ;;  %v286_v10 = vadd.f32 %v1191_v7, %v1505_v57 }
 0x11a   :  { %v280_v11 = vpop.f32.mrf.mxu0  ;;  %p1274_p4 = pnand %p1273_p3, %p1267_p0 }
 0x11b   :  { %v281_v12 = vadd.f32 %v1505_v57, %v280_v11  ;;  %1250 = vmatprep.mubr.msk.f32.mxu1 %vm356_vm0, %v333_v8  ;;  %v336_v15 = vmax.f32 %v286_v10, 0.0 }
 0x11c   :  { %v1194_v13 = vpop.f32.mrf.mxu0  ;;  %1251 = vmatmul.mubr.msk.f32.gmra.mxu1 %vm356_vm0, %v334_v9 }
 0x11d   :  { %v335_v14 = vmax.f32 %v281_v12, 0.0  ;;  %v296_v16 = vadd.f32 %v1194_v13, %v1505_v57 }
 0x11e   :  { %v290_v17 = vpop.f32.mrf.mxu0 }
 0x11f   :  { %v291_v18 = vadd.f32 %v1505_v57, %v290_v17  ;;  %1253 = vmatprep.mubr.msk.f32.mxu1 %vm356_vm0, %v335_v14  ;;  %v338_v21 = vmax.f32 %v296_v16, 0.0 }
 0x120   :  { %v1197_v19 = vpop.f32.mrf.mxu0  ;;  %1254 = vmatmul.mubr.msk.f32.gmra.mxu1 %vm356_vm0, %v336_v15 }
 0x121   :  { %v337_v20 = vmax.f32 %v291_v18, 0.0  ;;  %v306_v22 = vadd.f32 %v1197_v19, %v1505_v57 }
 0x122   :  { %v300_v23 = vpop.f32.mrf.mxu0 }
 0x123   :  { %v301_v24 = vadd.f32 %v1505_v57, %v300_v23  ;;  %1256 = vmatprep.mubr.msk.f32.mxu1 %vm356_vm0, %v337_v20  ;;  %v340_v26 = vmax.f32 %v306_v22, 0.0 }
 0x124   :  { %1257 = vmatmul.mubr.msk.f32.gmra.mxu1 %vm356_vm0, %v338_v21 }
 0x125   :  { %v339_v25 = vmax.f32 %v301_v24, 0.0 }
 0x127   :  { %1259 = vmatprep.mubr.msk.f32.mxu1 %vm356_vm0, %v339_v25 }
 0x128   :  { %1260 = vmatmul.mubr.msk.f32.gmra.mxu1 %vm356_vm0, %v340_v26 }
 0x129   :  { %1116 = vmatprep.mubr.msk.f32.mxu1 %vm721_vm1, %v1574_v27 }
 0x1ac   :  { %v1578_v57 = vpop.f32.mrf.mxu1 }
 0x1ae   :  { %v1580_v29 = vpop.f32.mrf.mxu1 }
 0x1b0   :  { %v1582_v31 = vpop.f32.mrf.mxu1 }
 0x1b2   :  { %v1584_v32 = vpop.f32.mrf.mxu1 }
 0x1b4   :  { %v1586_v33 = vpop.f32.mrf.mxu1 }
 0x1b6   :  { %v1588_v34 = vpop.f32.mrf.mxu1 }
 0x1b8   :  { %v1590_v35 = vpop.f32.mrf.mxu1 }
 0x1ba   :  { %v1592_v36 = vpop.f32.mrf.mxu1 }
 0x1bc   :  { %v1228_v37 = vpop.f32.mrf.mxu1 }
 0x1bd   :  { %v565_v23 = vadd.f32 %v1228_v37, %v1611_v60  ;;  %v555_v37 = vadd.f32 %v1590_v35, %v1611_v60  ;;  %v545_v35 = vadd.f32 %v1586_v33, %v1611_v60  ;;  %v535_v33 = vadd.f32 %v1582_v31, %v1611_v60 }
 0x1be   :  { %v1594_v38 = vpop.f32.mrf.mxu1  ;;  %v525_v31 = vadd.f32 %v1578_v57, %v1611_v60  ;;  %v717_v57 = vlaneseq }
 0x1bf   :  { %v687_v28 = vmax.f32 %v565_v23, 0.0  ;;  %v560_v30 = vadd.f32 %v1611_v60, %v1594_v38  ;;  %v550_v38 = vadd.f32 %v1611_v60, %v1592_v36  ;;  %v683_v36 = vmax.f32 %v545_v35, 0.0 }
 0x1c0   :  { %v1231_v39 = vpop.f32.mrf.mxu1  ;;  %vm912_vm2 = vcmp.lt.s32.totalorder %v717_v57, 256 }
 0x1c1   :  { %v575_v15 = vadd.f32 %v1231_v39, %v1611_v60 }
 0x1c2   :  { %v569_v40 = vpop.f32.mrf.mxu1 }
 0x1c3   :  { %v689_v19 = vmax.f32 %v575_v15, 0.0  ;;  %v570_v20 = vadd.f32 %v1611_v60, %v569_v40 }
 0x1c4   :  { %v1234_v41 = vpop.f32.mrf.mxu1 }
 0x1c5   :  { %v585_v7 = vadd.f32 %v1234_v41, %v1611_v60  ;;  %v688_v24 = vmax.f32 %v570_v20, 0.0  ;;  %v686_v41 = vmax.f32 %v560_v30, 0.0 }
 0x1c6   :  { %v579_v42 = vpop.f32.mrf.mxu1 }
 0x1c7   :  { %v691_v11 = vmax.f32 %v585_v7, 0.0  ;;  %v580_v12 = vadd.f32 %v1611_v60, %v579_v42  ;;  %v715_v7 = vpop.permute.xlu0 %714 }
 0x1c8   :  { %v1237_v43 = vpop.f32.mrf.mxu1 }
 0x1c9   :  { %v595_v61 = vadd.f32 %v1237_v43, %v1611_v60  ;;  %v690_v16 = vmax.f32 %v580_v12, 0.0 }
 0x1ca   :  { %v589_v44 = vpop.f32.mrf.mxu1 }
 0x1cb   :  { %v693_v3 = vmax.f32 %v595_v61, 0.0  ;;  %v590_v4 = vadd.f32 %v1611_v60, %v589_v44  ;;  %v685_v44 = vmax.f32 %v555_v37, 0.0 }
 0x1cc   :  { %v1596_v45 = vpop.f32.mrf.mxu1 }
 0x1cd   :  { %v692_v8 = vmax.f32 %v590_v4, 0.0 }
 0x1ce   :  { %v1598_v46 = vpop.f32.mrf.mxu1 }
 0x1d0   :  { %v1600_v47 = vpop.f32.mrf.mxu1 }
 0x1d2   :  { %v1602_v48 = vpop.f32.mrf.mxu1 }
 0x1d3   :  { %v610_v61 = vadd.f32 %v1611_v60, %v1602_v48 }
 0x1d4   :  { %v1604_v49 = vpop.f32.mrf.mxu1 }
 0x1d6   :  { %v1606_v50 = vpop.f32.mrf.mxu1 }
 0x1d8   :  { %v1249_v51 = vpop.f32.mrf.mxu1 }
 0x1d9   :  { %v635_v39 = vadd.f32 %v1249_v51, %v1611_v60  ;;  %v625_v51 = vadd.f32 %v1604_v49, %v1611_v60  ;;  %v540_v49 = vadd.f32 %v1611_v60, %v1588_v34  ;;  %v681_v34 = vmax.f32 %v535_v33, 0.0 }
 0x1da   :  { %v629_v52 = vpop.f32.mrf.mxu1 }
 0x1db   :  { %v701_v42 = vmax.f32 %v635_v39, 0.0  ;;  %v630_v43 = vadd.f32 %v1611_v60, %v629_v52  ;;  %v684_v52 = vmax.f32 %v550_v38, 0.0 }
 0x1dc   :  { %v1252_v53 = vpop.f32.mrf.mxu1 }
 0x1dd   :  { %v645_v21 = vadd.f32 %v1252_v53, %v1611_v60  ;;  %v700_v53 = vmax.f32 %v630_v43, 0.0 }
 0x1de   :  { %v639_v54 = vpop.f32.mrf.mxu1 }
 0x1df   :  { %v703_v25 = vmax.f32 %v645_v21, 0.0  ;;  %v640_v26 = vadd.f32 %v1611_v60, %v639_v54  ;;  %v699_v54 = vmax.f32 %v625_v51, 0.0 }
 0x1e0   :  { %v1255_v55 = vpop.f32.mrf.mxu1 }
 0x1e1   :  { %v655_v13 = vadd.f32 %v1255_v55, %v1611_v60  ;;  %v702_v40 = vmax.f32 %v640_v26, 0.0  ;;  %v620_v55 = vadd.f32 %v1611_v60, %v1606_v50  ;;  %v682_v50 = vmax.f32 %v540_v49, 0.0 }
 0x1e2   :  { %v649_v56 = vpop.f32.mrf.mxu1 }
 0x1e3   :  { %v705_v17 = vmax.f32 %v655_v13, 0.0  ;;  %v650_v18 = vadd.f32 %v1611_v60, %v649_v56  ;;  %v615_v56 = vadd.f32 %v1600_v47, %v1611_v60  ;;  %v530_v47 = vadd.f32 %v1611_v60, %v1584_v32 }
 0x1e4   :  { %v1258_v58 = vpop.f32.mrf.mxu1  ;;  %v679_v32 = vmax.f32 %v525_v31, 0.0 }
 0x1e5   :  { %v665_v5 = vadd.f32 %v1258_v58, %v1611_v60  ;;  %v704_v22 = vmax.f32 %v650_v18, 0.0  ;;  %v698_v58 = vmax.f32 %v620_v55, 0.0  ;;  %v680_v48 = vmax.f32 %v530_v47, 0.0 }
 0x1e6   :  { %v659_v59 = vpop.f32.mrf.mxu1 }
 0x1e7   :  { %v707_v9 = vmax.f32 %v665_v5, 0.0  ;;  %v660_v10 = vadd.f32 %v1611_v60, %v659_v59  ;;  %v697_v59 = vmax.f32 %v615_v56, 0.0  ;;  %v1289_v5 = vmov 1966171168  }
 0x1e8   :  { %v1261_v62 = vpop.f32.mrf.mxu1 }
 0x1e9   :  { %v675_v63 = vadd.f32 %v1261_v62, %v1611_v60  ;;  %v706_v14 = vmax.f32 %v660_v10, 0.0  ;;  %v605_v62 = vadd.f32 %v1596_v45, %v1611_v60  ;;  %v520_v45 = vadd.f32 %v1611_v60, %v1580_v29 }
 0x1ea   :  { %v669_v0 = vpop.f32.mrf.mxu1 }
 0x1eb   :  { %v709_v1 = vmax.f32 %v675_v63, 0.0  ;;  %v670_v2 = vadd.f32 %v1611_v60, %v669_v0  ;;  %v696_v63 = vmax.f32 %v610_v61, 0.0  ;;  %v695_v0 = vmax.f32 %v605_v62, 0.0 }
 0x1ed   :  { %v708_v6 = vmax.f32 %v670_v2, 0.0  ;;  %1084 = vmatprep.subr.msk.mxu1 %vm721_vm1, %v709_v1  ;;  %v600_v1 = vadd.f32 %v1611_v60, %v1598_v46  ;;  %v718_v46 = vshrl.u32 %v717_v57, 7 }
 0x1ee   :  { %1085 = vmatpush3.xpose.msk.msra.mxu1 %vm721_vm1, %v693_v3  ;;  %v678_v3 = vmax.f32 %v520_v45, 0.0 }
 0x1ef   :  { %1086 = vmatprep.subr.msk.mxu1 %vm721_vm1, %v708_v6  ;;  %v694_v2 = vmax.f32 %v600_v1, 0.0  ;;  %v719_v4 = vsub.s32 0, %v718_v46  ;;  %v896_v6 = vunpack.c.l.s4 %v1289_v5 }
 0x1f2   :  { %1087 = vmatpush3.xpose.msk.msra.mxu1 %vm721_vm1, %v692_v8  ;;  %v720_v8 = vrot.slane %v715_v7, %v719_v4 }
 0x1f3   :  { %1088 = vmatprep.subr.msk.mxu1 %vm721_vm1, %v707_v9  ;;  %v897_v9 = vunpack.c.0.s8 %v896_v6 }
 0x1f5   :  { %v900_v12 = vsub.s32 %v897_v9, %v718_v46 }
 0x1f6   :  { %1089 = vmatpush3.xpose.msk.msra.mxu1 %vm721_vm1, %v691_v11 }
 0x1f7   :  { %1090 = vmatprep.subr.msk.mxu1 %vm721_vm1, %v706_v14 }
 0x1fa   :  { %1091 = vmatpush3.xpose.msk.msra.mxu1 %vm721_vm1, %v690_v16 }
 0x1fb   :  { %1092 = vmatprep.subr.msk.mxu1 %vm721_vm1, %v705_v17 }
 0x1fe   :  { %1093 = vmatpush3.xpose.msk.msra.mxu1 %vm721_vm1, %v689_v19 }
 0x1ff   :  { %1094 = vmatprep.subr.msk.mxu1 %vm721_vm1, %v704_v22 }
 0x202   :  { %1095 = vmatpush3.xpose.msk.msra.mxu1 %vm721_vm1, %v688_v24 }
 0x203   :  { %1096 = vmatprep.subr.msk.mxu1 %vm721_vm1, %v703_v25 }
 0x206   :  { %1097 = vmatpush3.xpose.msk.msra.mxu1 %vm721_vm1, %v687_v28 }
 0x207   :  { %1098 = vmatprep.subr.msk.mxu1 %vm721_vm1, %v702_v40 }
 0x20a   :  { %1099 = vmatpush3.xpose.msk.msra.mxu1 %vm721_vm1, %v686_v41 }
 0x20b   :  { %1100 = vmatprep.subr.msk.mxu1 %vm721_vm1, %v701_v42 }
 0x20e   :  { %1101 = vmatpush3.xpose.msk.msra.mxu1 %vm721_vm1, %v685_v44 }
 0x20f   :  { %1102 = vmatprep.subr.msk.mxu1 %vm721_vm1, %v700_v53 }
 0x212   :  { %1103 = vmatpush3.xpose.msk.msra.mxu1 %vm721_vm1, %v684_v52 }
 0x213   :  { %1104 = vmatprep.subr.msk.mxu1 %vm721_vm1, %v699_v54 }
 0x216   :  { %1105 = vmatpush3.xpose.msk.msra.mxu1 %vm721_vm1, %v683_v36 }
 0x217   :  { %1106 = vmatprep.subr.msk.mxu1 %vm721_vm1, %v698_v58 }
 0x21a   :  { %1107 = vmatpush3.xpose.msk.msra.mxu1 %vm721_vm1, %v682_v50 }
 0x21b   :  { %1108 = vmatprep.subr.msk.mxu1 %vm721_vm1, %v697_v59 }
 0x21e   :  { %1109 = vmatpush3.xpose.msk.msra.mxu1 %vm721_vm1, %v681_v34 }
 0x21f   :  { %1110 = vmatprep.subr.msk.mxu1 %vm721_vm1, %v696_v63 }
 0x222   :  { %1111 = vmatpush3.xpose.msk.msra.mxu1 %vm721_vm1, %v680_v48 }
 0x223   :  { %1112 = vmatprep.subr.msk.mxu1 %vm721_vm1, %v695_v0 }
 0x226   :  { %1113 = vmatpush3.xpose.msk.msra.mxu1 %vm721_vm1, %v679_v32 }
 0x227   :  { %1114 = vmatprep.subr.msk.mxu1 %vm721_vm1, %v694_v2 }
 0x22a   :  { %1115 = vmatpush3.xpose.msk.msra.mxu1 %vm721_vm1, %v678_v3 }
 0x22d   :  { %1117 = vmatmul.mubr.msk.f32.vlgmr.msra.gmra.mxu1 %vm721_vm1, %v1574_v27 }
 0x2ed   :  { %v887_v29 = vpop.f32.mrf.mxu1 }
 0x2ee   :  { %v888_v10 = vadd.f32 %v887_v29, %v720_v8 }
 0x2ef   :  { %v889_v60 = vpop.f32.mrf.mxu1 }
 0x2f0   :  { %v890_v11 = vadd.f32 %v889_v60, %v720_v8 }
 0x2f2   :  { %v894_v13 = vcombine.low %v888_v10, %v890_v11 }
 0x2f4   :  { %v901_v14 = vrot.slane %v894_v13, %v900_v12 }
 0x2f6   :  { %v908_v15 = vrot.slane %v901_v14, %v900_v12 }
 0x2f8   :  { %914 = vst.msk [vmem:[#allocation3] sm:$0x3] %vm912_vm2, %v908_v15 }
 0x2f9   :  { %1277 = shalt.err (!%p1274_p4)
}
 0x2fa   :  { %924 = dma.vmem_to_hbm [thread:$0]  %s922_s17, 32, %s1704_s7, [#allocation4]  }
 0x2fb   :  { %1286 = dma.done.wait [#allocation4], 32  }
 0x2fc   :  { %1287 = vsyncadd [#allocation4], 4294967264 }
 0x2fd   :  { %928 = vsyncpa [#allocation4], 1 }

// kernel: tpu_custom_call.1
= control target key start
LH: loop header
LB: loop body
LE: loop exit
PB: predicated region body
PF: predicated region fallthrough
CT: control target
= control target key end

     0   :  { %s1697_s0 = inlined_call_operand.vmem [shape: f32[256,128], index: 0, kind: input, shape index: {}]   ;;  %s1698_s1 = inlined_call_operand.vmem [shape: f32[128,64], index: 1, kind: input, shape index: {}]   ;;  %s1699_s2 = inlined_call_operand.vmem [shape: f32[1,64], index: 2, kind: input, shape index: {}]   ;;  %s1700_s3 = inlined_call_operand.vmem [shape: f32[64,32], index: 3, kind: input, shape index: {}]   ;;  %s1701_s4 = inlined_call_operand.vmem [shape: f32[1,32], index: 4, kind: input, shape index: {}]   ;;  %s1702_s5 = inlined_call_operand.vmem [shape: f32[1,32], index: 5, kind: input, shape index: {}]   ;;  %s1703_s6 = inlined_call_operand.<no memory space> [shape: f32[1,1], index: 6, kind: input, shape index: {}]   ;;  %s1704_s7 = inlined_call_operand.hbm [shape: f32[1,256], index: 7, kind: output, shape index: {}]  }
   0x1   :  { %v12_v0 = vstv %s1703_s6 }
   0x2   :  { %13 = vst [vmem:[#allocation2] sm:$0x1] %v12_v0 }
   0x3   :  { %v76_v1 = vld [vmem:[%s1698_s1 + $0x78] sm:$0xff]  ;;  %v75_v2 = vld [vmem:[%s1698_s1 + $0x70] sm:$0xff]  ;;  %v74_v3 = vld [vmem:[%s1698_s1 + $0x68] sm:$0xff] }
   0x4   :  { %1118 = vmatprep.subr.mxu0 %v76_v1  ;;  %v73_v4 = vld [vmem:[%s1698_s1 + $0x60] sm:$0xff]  ;;  %v72_v6 = vld [vmem:[%s1698_s1 + $0x58] sm:$0xff]  ;;  %v71_v7 = vld [vmem:[%s1698_s1 + $0x50] sm:$0xff] }
   0x5   :  { %1119 = vmatpush3.msra.mxu0 %v76_v1  ;;  %v29_v5 = vld [vmem:[%s1697_s0] sm:$0xff]  ;;  %v70_v8 = vld [vmem:[%s1698_s1 + $0x48] sm:$0xff]  ;;  %v68_v10 = vld [vmem:[%s1698_s1 + $0x38] sm:$0xff] }
   0x6   :  { %1120 = vmatprep.subr.mxu0 %v75_v2  ;;  %1150 = vmatprep.mubr.f32.mxu0 %v29_v5  ;;  %v69_v9 = vld [vmem:[%s1698_s1 + $0x40] sm:$0xff]  ;;  %v67_v11 = vld [vmem:[%s1698_s1 + $0x30] sm:$0xff]  ;;  %v348_v12 = vld [vmem:[%s1700_s3 + $0x38] sm:$0xff] }
   0x7   :  { %1121 = vmatpush3.msra.mxu0 %v75_v2  ;;  %v347_v13 = vld [vmem:[%s1700_s3 + $0x30] sm:$0xff]  ;;  %1198 = vmatprep.subr.mxu1 %v348_v12 }
   0x8   :  { %1122 = vmatprep.subr.mxu0 %v74_v3 }
   0x9   :  { %1123 = vmatpush3.msra.mxu0 %v74_v3 }
   0xa   :  { %1124 = vmatprep.subr.mxu0 %v73_v4 }
   0xb   :  { %1125 = vmatpush3.msra.mxu0 %v73_v4 }
   0xc   :  { %1126 = vmatprep.subr.mxu0 %v72_v6 }
   0xd   :  { %1127 = vmatpush3.msra.mxu0 %v72_v6 }
   0xe   :  { %1128 = vmatprep.subr.mxu0 %v71_v7 }
   0xf   :  { %1129 = vmatpush3.msra.mxu0 %v71_v7 }
  0x10   :  { %1130 = vmatprep.subr.mxu0 %v70_v8 }
  0x11   :  { %1131 = vmatpush3.msra.mxu0 %v70_v8 }
  0x12   :  { %1132 = vmatprep.subr.mxu0 %v69_v9 }
  0x13   :  { %1133 = vmatpush3.msra.mxu0 %v69_v9 }
  0x14   :  { %1134 = vmatprep.subr.mxu0 %v68_v10 }
  0x15   :  { %14 = vsyncpa [#allocation4], 0  ;;  %1135 = vmatpush3.msra.mxu0 %v68_v10  ;;  %v66_v14 = vld [vmem:[%s1698_s1 + $0x28] sm:$0xff]  ;;  %1199 = vmatpush3.msra.mxu1 %v348_v12  ;;  %v65_v16 = vld [vmem:[%s1698_s1 + $0x20] sm:$0xff]  ;;  %vm356_vm0 = vcmask 523264   ;;  %vm721_vm1 = vcmask 261120  }
  0x16   :  { %v346_v15 = vld [vmem:[%s1700_s3 + $0x28] sm:$0xff]  ;;  %1136 = vmatprep.subr.mxu0 %v67_v11  ;;  %1200 = vmatprep.subr.mxu1 %v347_v13  ;;  %v345_v17 = vld [vmem:[%s1700_s3 + $0x20] sm:$0xff]  ;;  %v64_v18 = vld [vmem:[%s1698_s1 + $0x18] sm:$0xff] }
  0x17   :  { %1137 = vmatpush3.msra.mxu0 %v67_v11  ;;  %1201 = vmatpush3.msra.mxu1 %v347_v13  ;;  %v63_v19 = vld [vmem:[%s1698_s1 + $0x10] sm:$0xff]  ;;  %v62_v20 = vld [vmem:[%s1698_s1 + $0x8] sm:$0xff]  ;;  %v61_v21 = vld [vmem:[%s1698_s1] sm:$0xff] }
  0x18   :  { %1138 = vmatprep.subr.mxu0 %v66_v14  ;;  %1202 = vmatprep.subr.mxu1 %v346_v15  ;;  %v30_v22 = vld [vmem:[%s1697_s0 + $0x8] sm:$0xff]  ;;  %v31_v23 = vld [vmem:[%s1697_s0 + $0x10] sm:$0xff]  ;;  %v32_v24 = vld [vmem:[%s1697_s0 + $0x18] sm:$0xff] }
  0x19   :  { %1139 = vmatpush3.msra.mxu0 %v66_v14  ;;  %1203 = vmatpush3.msra.mxu1 %v346_v15  ;;  %v33_v25 = vld [vmem:[%s1697_s0 + $0x20] sm:$0xff]  ;;  %v34_v26 = vld [vmem:[%s1697_s0 + $0x28] sm:$0xff]  ;;  %v35_v27 = vld [vmem:[%s1697_s0 + $0x30] sm:$0xff] }
  0x1a   :  { %1140 = vmatprep.subr.mxu0 %v65_v16  ;;  %1204 = vmatprep.subr.mxu1 %v345_v17  ;;  %v36_v28 = vld [vmem:[%s1697_s0 + $0x38] sm:$0xff]  ;;  %v37_v29 = vld [vmem:[%s1697_s0 + $0x40] sm:$0xff]  ;;  %v38_v30 = vld [vmem:[%s1697_s0 + $0x48] sm:$0xff] }
  0x1b   :  { %1141 = vmatpush3.msra.mxu0 %v65_v16  ;;  %1205 = vmatpush3.msra.mxu1 %v345_v17  ;;  %v39_v31 = vld [vmem:[%s1697_s0 + $0x50] sm:$0xff]  ;;  %v40_v32 = vld [vmem:[%s1697_s0 + $0x58] sm:$0xff]  ;;  %v41_v33 = vld [vmem:[%s1697_s0 + $0x60] sm:$0xff] }
  0x1c   :  { %1142 = vmatprep.subr.mxu0 %v64_v18  ;;  %v42_v34 = vld [vmem:[%s1697_s0 + $0x68] sm:$0xff]  ;;  %v43_v35 = vld [vmem:[%s1697_s0 + $0x70] sm:$0xff]  ;;  %v44_v36 = vld [vmem:[%s1697_s0 + $0x78] sm:$0xff] }
  0x1d   :  { %1143 = vmatpush3.msra.mxu0 %v64_v18  ;;  %v45_v37 = vld [vmem:[%s1697_s0 + $0x80] sm:$0xff]  ;;  %v46_v38 = vld [vmem:[%s1697_s0 + $0x88] sm:$0xff]  ;;  %v47_v39 = vld [vmem:[%s1697_s0 + $0x90] sm:$0xff] }
  0x1e   :  { %1144 = vmatprep.subr.mxu0 %v63_v19  ;;  %v48_v40 = vld [vmem:[%s1697_s0 + $0x98] sm:$0xff]  ;;  %v49_v41 = vld [vmem:[%s1697_s0 + $0xa0] sm:$0xff]  ;;  %v50_v42 = vld [vmem:[%s1697_s0 + $0xa8] sm:$0xff] }
  0x1f   :  { %1145 = vmatpush3.msra.mxu0 %v63_v19  ;;  %v51_v43 = vld [vmem:[%s1697_s0 + $0xb0] sm:$0xff]  ;;  %v52_v44 = vld [vmem:[%s1697_s0 + $0xb8] sm:$0xff]  ;;  %v53_v45 = vld [vmem:[%s1697_s0 + $0xc0] sm:$0xff] }
  0x20   :  { %1146 = vmatprep.subr.mxu0 %v62_v20  ;;  %v54_v46 = vld [vmem:[%s1697_s0 + $0xc8] sm:$0xff]  ;;  %v55_v47 = vld [vmem:[%s1697_s0 + $0xd0] sm:$0xff]  ;;  %v56_v48 = vld [vmem:[%s1697_s0 + $0xd8] sm:$0xff] }
  0x21   :  { %1147 = vmatpush3.msra.mxu0 %v62_v20  ;;  %v57_v49 = vld [vmem:[%s1697_s0 + $0xe0] sm:$0xff]  ;;  %v58_v50 = vld [vmem:[%s1697_s0 + $0xe8] sm:$0xff]  ;;  %v59_v51 = vld [vmem:[%s1697_s0 + $0xf0] sm:$0xff] }
  0x22   :  { %1148 = vmatprep.subr.mxu0 %v61_v21  ;;  %v60_v52 = vld [vmem:[%s1697_s0 + $0xf8] sm:$0xff]  ;;  %v343_v54 = vld [vmem:[%s1700_s3 + $0x10] sm:$0xff]  ;;  %v342_v55 = vld [vmem:[%s1700_s3 + $0x8] sm:$0xff] }
  0x23   :  { %1149 = vmatpush3.msra.mxu0 %v61_v21  ;;  %v344_v53 = vld [vmem:[%s1700_s3 + $0x18] sm:$0xff]  ;;  %v341_v56 = vld [vmem:[%s1700_s3] sm:$0xff] }
  0x24   :  { %1151 = vmatmul.mubr.f32.vlgmr.msra.gmra.mxu0 %v30_v22  ;;  %1206 = vmatprep.subr.mxu1 %v344_v53  ;;  %v1505_v57 = vld [vmem:[%s1699_s2] ss:$0 sm:$0xff] }
  0x25   :  { %1153 = vmatprep.mubr.f32.mxu0 %v31_v23  ;;  %1207 = vmatpush3.msra.mxu1 %v344_v53 }
  0x26   :  { %1208 = vmatprep.subr.mxu1 %v343_v54 }
  0x27   :  { %1209 = vmatpush3.msra.mxu1 %v343_v54 }
  0x28   :  { %1154 = vmatmul.mubr.f32.gmra.mxu0 %v32_v24  ;;  %1210 = vmatprep.subr.mxu1 %v342_v55 }
  0x29   :  { %1156 = vmatprep.mubr.f32.mxu0 %v33_v25  ;;  %1211 = vmatpush3.msra.mxu1 %v342_v55 }
  0x2a   :  { %1212 = vmatprep.subr.mxu1 %v341_v56 }
  0x2b   :  { %1213 = vmatpush3.msra.mxu1 %v341_v56 }
  0x2c   :  { %1157 = vmatmul.mubr.f32.gmra.mxu0 %v34_v26 }
  0x2d   :  { %1159 = vmatprep.mubr.f32.mxu0 %v35_v27 }
  0x30   :  { %1160 = vmatmul.mubr.f32.gmra.mxu0 %v36_v28 }
  0x31   :  { %1162 = vmatprep.mubr.f32.mxu0 %v37_v29 }
  0x34   :  { %1163 = vmatmul.mubr.f32.gmra.mxu0 %v38_v30 }
  0x35   :  { %1165 = vmatprep.mubr.f32.mxu0 %v39_v31 }
  0x38   :  { %1166 = vmatmul.mubr.f32.gmra.mxu0 %v40_v32 }
  0x39   :  { %1168 = vmatprep.mubr.f32.mxu0 %v41_v33 }
  0x3c   :  { %1169 = vmatmul.mubr.f32.gmra.mxu0 %v42_v34 }
  0x3d   :  { %1171 = vmatprep.mubr.f32.mxu0 %v43_v35 }
  0x40   :  { %1172 = vmatmul.mubr.f32.gmra.mxu0 %v44_v36 }
  0x41   :  { %1174 = vmatprep.mubr.f32.mxu0 %v45_v37 }
  0x44   :  { %1175 = vmatmul.mubr.f32.gmra.mxu0 %v46_v38 }
  0x45   :  { %1177 = vmatprep.mubr.f32.mxu0 %v47_v39 }
  0x48   :  { %1178 = vmatmul.mubr.f32.gmra.mxu0 %v48_v40 }
  0x49   :  { %1180 = vmatprep.mubr.f32.mxu0 %v49_v41 }
  0x4c   :  { %1181 = vmatmul.mubr.f32.gmra.mxu0 %v50_v42 }
  0x4d   :  { %1183 = vmatprep.mubr.f32.mxu0 %v51_v43 }
  0x50   :  { %1184 = vmatmul.mubr.f32.gmra.mxu0 %v52_v44 }
  0x51   :  { %1186 = vmatprep.mubr.f32.mxu0 %v53_v45 }
  0x54   :  { %1187 = vmatmul.mubr.f32.gmra.mxu0 %v54_v46 }
  0x55   :  { %1189 = vmatprep.mubr.f32.mxu0 %v55_v47 }
  0x58   :  { %1190 = vmatmul.mubr.f32.gmra.mxu0 %v56_v48 }
  0x59   :  { %1192 = vmatprep.mubr.f32.mxu0 %v57_v49 }
  0x5c   :  { %1193 = vmatmul.mubr.f32.gmra.mxu0 %v58_v50 }
  0x5d   :  { %1195 = vmatprep.mubr.f32.mxu0 %v59_v51 }
  0x60   :  { %1196 = vmatmul.mubr.f32.gmra.mxu0 %v60_v52 }
  0xe4   :  { %v1152_v58 = vpop.f32.mrf.mxu0 }
  0xe5   :  { %v156_v59 = vadd.f32 %v1152_v58, %v1505_v57 }
  0xe6   :  { %v150_v60 = vpop.f32.mrf.mxu0 }
  0xe7   :  { %v151_v61 = vadd.f32 %v1505_v57, %v150_v60  ;;  %v310_v0 = vmax.f32 %v156_v59, 0.0 }
  0xe8   :  { %v1155_v62 = vpop.f32.mrf.mxu0 }
  0xe9   :  { %v309_v63 = vmax.f32 %v151_v61, 0.0  ;;  %v166_v1 = vadd.f32 %v1155_v62, %v1505_v57 }
  0xea   :  { %v160_v2 = vpop.f32.mrf.mxu0 }
  0xeb   :  { %v161_v3 = vadd.f32 %v1505_v57, %v160_v2  ;;  %1214 = vmatprep.mubr.msk.f32.mxu1 %vm356_vm0, %v309_v63  ;;  %v312_v6 = vmax.f32 %v166_v1, 0.0 }
  0xec   :  { %v1158_v4 = vpop.f32.mrf.mxu0  ;;  %1215 = vmatmul.mubr.msk.f32.vlgmr.msra.gmra.mxu1 %vm356_vm0, %v310_v0 }
  0xed   :  { %v311_v5 = vmax.f32 %v161_v3, 0.0  ;;  %v176_v7 = vadd.f32 %v1158_v4, %v1505_v57 }
  0xee   :  { %v170_v8 = vpop.f32.mrf.mxu0 }
  0xef   :  { %v171_v9 = vadd.f32 %v1505_v57, %v170_v8  ;;  %1217 = vmatprep.mubr.msk.f32.mxu1 %vm356_vm0, %v311_v5  ;;  %v314_v12 = vmax.f32 %v176_v7, 0.0 }
  0xf0   :  { %v1161_v10 = vpop.f32.mrf.mxu0  ;;  %1218 = vmatmul.mubr.msk.f32.gmra.mxu1 %vm356_vm0, %v312_v6 }
  0xf1   :  { %v313_v11 = vmax.f32 %v171_v9, 0.0  ;;  %v186_v13 = vadd.f32 %v1161_v10, %v1505_v57 }
  0xf2   :  { %v180_v14 = vpop.f32.mrf.mxu0 }
  0xf3   :  { %v181_v15 = vadd.f32 %v1505_v57, %v180_v14  ;;  %1220 = vmatprep.mubr.msk.f32.mxu1 %vm356_vm0, %v313_v11  ;;  %v316_v18 = vmax.f32 %v186_v13, 0.0 }
  0xf4   :  { %v1164_v16 = vpop.f32.mrf.mxu0  ;;  %1221 = vmatmul.mubr.msk.f32.gmra.mxu1 %vm356_vm0, %v314_v12 }
  0xf5   :  { %v315_v17 = vmax.f32 %v181_v15, 0.0  ;;  %v196_v19 = vadd.f32 %v1164_v16, %v1505_v57 }
  0xf6   :  { %v190_v20 = vpop.f32.mrf.mxu0 }
  0xf7   :  { %v191_v21 = vadd.f32 %v1505_v57, %v190_v20  ;;  %1223 = vmatprep.mubr.msk.f32.mxu1 %vm356_vm0, %v315_v17  ;;  %v318_v24 = vmax.f32 %v196_v19, 0.0 }
  0xf8   :  { %v1167_v22 = vpop.f32.mrf.mxu0  ;;  %1224 = vmatmul.mubr.msk.f32.gmra.mxu1 %vm356_vm0, %v316_v18 }
  0xf9   :  { %v317_v23 = vmax.f32 %v191_v21, 0.0  ;;  %v206_v25 = vadd.f32 %v1167_v22, %v1505_v57 }
  0xfa   :  { %v200_v26 = vpop.f32.mrf.mxu0 }
  0xfb   :  { %v201_v27 = vadd.f32 %v1505_v57, %v200_v26  ;;  %1226 = vmatprep.mubr.msk.f32.mxu1 %vm356_vm0, %v317_v23  ;;  %v320_v30 = vmax.f32 %v206_v25, 0.0 }
  0xfc   :  { %v1170_v28 = vpop.f32.mrf.mxu0  ;;  %1227 = vmatmul.mubr.msk.f32.gmra.mxu1 %vm356_vm0, %v318_v24 }
  0xfd   :  { %v319_v29 = vmax.f32 %v201_v27, 0.0  ;;  %v216_v31 = vadd.f32 %v1170_v28, %v1505_v57  ;;  %v1574_v27 = vld [vmem:[%s1702_s5] sm:$0x1] }
  0xfe   :  { %v210_v32 = vpop.f32.mrf.mxu0  ;;  %v711_v28 = vld [vmem:[#allocation2] sm:$0x1] }
  0xff   :  { %v211_v33 = vadd.f32 %v1505_v57, %v210_v32  ;;  %1229 = vmatprep.mubr.msk.f32.mxu1 %vm356_vm0, %v319_v29  ;;  %v322_v36 = vmax.f32 %v216_v31, 0.0 }
 0x100   :  { %v1173_v34 = vpop.f32.mrf.mxu0  ;;  %1230 = vmatmul.mubr.msk.f32.gmra.mxu1 %vm356_vm0, %v320_v30  ;;  %v1288_v30 = vmov 0  }
 0x101   :  { %v321_v35 = vmax.f32 %v211_v33, 0.0  ;;  %v226_v37 = vadd.f32 %v1173_v34, %v1505_v57  ;;  %1265 = vset.pattern.permute.xlu0 %v1288_v30 }
 0x102   :  { %v220_v38 = vpop.f32.mrf.mxu0  ;;  %714 = vperm.xlu0 %1265, %v711_v28  }
 0x103   :  { %v221_v39 = vadd.f32 %v1505_v57, %v220_v38  ;;  %1232 = vmatprep.mubr.msk.f32.mxu1 %vm356_vm0, %v321_v35  ;;  %v324_v42 = vmax.f32 %v226_v37, 0.0 }
 0x104   :  { %v1176_v40 = vpop.f32.mrf.mxu0  ;;  %1233 = vmatmul.mubr.msk.f32.gmra.mxu1 %vm356_vm0, %v322_v36 }
 0x105   :  { %v323_v41 = vmax.f32 %v221_v39, 0.0  ;;  %v236_v43 = vadd.f32 %v1176_v40, %v1505_v57 }
 0x106   :  { %v230_v44 = vpop.f32.mrf.mxu0 }
 0x107   :  { %v231_v45 = vadd.f32 %v1505_v57, %v230_v44  ;;  %1235 = vmatprep.mubr.msk.f32.mxu1 %vm356_vm0, %v323_v41  ;;  %v326_v48 = vmax.f32 %v236_v43, 0.0 }
 0x108   :  { %v1179_v46 = vpop.f32.mrf.mxu0  ;;  %1236 = vmatmul.mubr.msk.f32.gmra.mxu1 %vm356_vm0, %v324_v42 }
 0x109   :  { %v325_v47 = vmax.f32 %v231_v45, 0.0  ;;  %v246_v49 = vadd.f32 %v1179_v46, %v1505_v57 }
 0x10a   :  { %v240_v50 = vpop.f32.mrf.mxu0 }
 0x10b   :  { %v241_v51 = vadd.f32 %v1505_v57, %v240_v50  ;;  %1238 = vmatprep.mubr.msk.f32.mxu1 %vm356_vm0, %v325_v47  ;;  %v328_v54 = vmax.f32 %v246_v49, 0.0 }
 0x10c   :  { %v1182_v52 = vpop.f32.mrf.mxu0  ;;  %1239 = vmatmul.mubr.msk.f32.gmra.mxu1 %vm356_vm0, %v326_v48 }
 0x10d   :  { %v327_v53 = vmax.f32 %v241_v51, 0.0  ;;  %v256_v55 = vadd.f32 %v1182_v52, %v1505_v57 }
 0x10e   :  { %v250_v56 = vpop.f32.mrf.mxu0 }
 0x10f   :  { %v251_v58 = vadd.f32 %v1505_v57, %v250_v56  ;;  %1241 = vmatprep.mubr.msk.f32.mxu1 %vm356_vm0, %v327_v53  ;;  %v330_v61 = vmax.f32 %v256_v55, 0.0 }
 0x110   :  { %v1185_v59 = vpop.f32.mrf.mxu0  ;;  %1242 = vmatmul.mubr.msk.f32.gmra.mxu1 %vm356_vm0, %v328_v54 }
 0x111   :  { %v329_v60 = vmax.f32 %v251_v58, 0.0  ;;  %v266_v62 = vadd.f32 %v1185_v59, %v1505_v57 }
 0x112   :  { %v260_v63 = vpop.f32.mrf.mxu0 }
 0x113   :  { %v261_v0 = vadd.f32 %v1505_v57, %v260_v63  ;;  %1244 = vmatprep.mubr.msk.f32.mxu1 %vm356_vm0, %v329_v60  ;;  %v332_v3 = vmax.f32 %v266_v62, 0.0  ;;  %v1611_v60 = vld [vmem:[%s1701_s4] ss:$0 sm:$0xff]  ;;  %s1290_s4 = smov [#allocation3]  }
 0x114   :  { %v1188_v1 = vpop.f32.mrf.mxu0  ;;  %1245 = vmatmul.mubr.msk.f32.gmra.mxu1 %vm356_vm0, %v330_v61  ;;  %s921_s17 = sshll.u32 %s1290_s4, 4  ;;  %s922_s17 = int_to_ptr.vmem [resolvable:$true] %s921_s17 }
 0x115   :  { %v331_v2 = vmax.f32 %v261_v0, 0.0  ;;  %v276_v4 = vadd.f32 %v1188_v1, %v1505_v57  ;;  %s1266_s18 = scalar_lea.vmem %s922_s17, 32  ;;  %p1271_p1 = scmp.lt.s32.totalorder %s922_s17, %s922_s17 }
 0x116   :  { %v270_v5 = vpop.f32.mrf.mxu0  ;;  %p1267_p0 = scmp.ne.s32.totalorder %s922_s17, %s1266_s18  ;;  %p1272_p2 = scmp.lt.s32.totalorder %s1266_s18, %s1266_s18 }
 0x117   :  { %v271_v6 = vadd.f32 %v1505_v57, %v270_v5  ;;  %1247 = vmatprep.mubr.msk.f32.mxu1 %vm356_vm0, %v331_v2  ;;  %v334_v9 = vmax.f32 %v276_v4, 0.0 }
 0x118   :  { %v1191_v7 = vpop.f32.mrf.mxu0  ;;  %1248 = vmatmul.mubr.msk.f32.gmra.mxu1 %vm356_vm0, %v332_v3  ;;  %p1273_p3 = por %p1272_p2, %p1271_p1 }
 0x119   :  { %v333_v8 = vmax.f32 %v271_v6, 0.0  ;;  %v286_v10 = vadd.f32 %v1191_v7, %v1505_v57 }
 0x11a   :  { %v280_v11 = vpop.f32.mrf.mxu0  ;;  %p1274_p4 = pnand %p1273_p3, %p1267_p0 }
 0x11b   :  { %v281_v12 = vadd.f32 %v1505_v57, %v280_v11  ;;  %1250 = vmatprep.mubr.msk.f32.mxu1 %vm356_vm0, %v333_v8  ;;  %v336_v15 = vmax.f32 %v286_v10, 0.0 }
 0x11c   :  { %v1194_v13 = vpop.f32.mrf.mxu0  ;;  %1251 = vmatmul.mubr.msk.f32.gmra.mxu1 %vm356_vm0, %v334_v9 }
 0x11d   :  { %v335_v14 = vmax.f32 %v281_v12, 0.0  ;;  %v296_v16 = vadd.f32 %v1194_v13, %v1505_v57 }
 0x11e   :  { %v290_v17 = vpop.f32.mrf.mxu0 }
 0x11f   :  { %v291_v18 = vadd.f32 %v1505_v57, %v290_v17  ;;  %1253 = vmatprep.mubr.msk.f32.mxu1 %vm356_vm0, %v335_v14  ;;  %v338_v21 = vmax.f32 %v296_v16, 0.0 }
 0x120   :  { %v1197_v19 = vpop.f32.mrf.mxu0  ;;  %1254 = vmatmul.mubr.msk.f32.gmra.mxu1 %vm356_vm0, %v336_v15 }
 0x121   :  { %v337_v20 = vmax.f32 %v291_v18, 0.0  ;;  %v306_v22 = vadd.f32 %v1197_v19, %v1505_v57 }
 0x122   :  { %v300_v23 = vpop.f32.mrf.mxu0 }
 0x123   :  { %v301_v24 = vadd.f32 %v1505_v57, %v300_v23  ;;  %1256 = vmatprep.mubr.msk.f32.mxu1 %vm356_vm0, %v337_v20  ;;  %v340_v26 = vmax.f32 %v306_v22, 0.0 }
 0x124   :  { %1257 = vmatmul.mubr.msk.f32.gmra.mxu1 %vm356_vm0, %v338_v21 }
 0x125   :  { %v339_v25 = vmax.f32 %v301_v24, 0.0 }
 0x127   :  { %1259 = vmatprep.mubr.msk.f32.mxu1 %vm356_vm0, %v339_v25 }
 0x128   :  { %1260 = vmatmul.mubr.msk.f32.gmra.mxu1 %vm356_vm0, %v340_v26 }
 0x129   :  { %1116 = vmatprep.mubr.msk.f32.mxu1 %vm721_vm1, %v1574_v27 }
 0x1ac   :  { %v1578_v57 = vpop.f32.mrf.mxu1 }
 0x1ae   :  { %v1580_v29 = vpop.f32.mrf.mxu1 }
 0x1b0   :  { %v1582_v31 = vpop.f32.mrf.mxu1 }
 0x1b2   :  { %v1584_v32 = vpop.f32.mrf.mxu1 }
 0x1b4   :  { %v1586_v33 = vpop.f32.mrf.mxu1 }
 0x1b6   :  { %v1588_v34 = vpop.f32.mrf.mxu1 }
 0x1b8   :  { %v1590_v35 = vpop.f32.mrf.mxu1 }
 0x1ba   :  { %v1592_v36 = vpop.f32.mrf.mxu1 }
 0x1bc   :  { %v1228_v37 = vpop.f32.mrf.mxu1 }
 0x1bd   :  { %v565_v23 = vadd.f32 %v1228_v37, %v1611_v60  ;;  %v555_v37 = vadd.f32 %v1590_v35, %v1611_v60  ;;  %v545_v35 = vadd.f32 %v1586_v33, %v1611_v60  ;;  %v535_v33 = vadd.f32 %v1582_v31, %v1611_v60 }
 0x1be   :  { %v1594_v38 = vpop.f32.mrf.mxu1  ;;  %v525_v31 = vadd.f32 %v1578_v57, %v1611_v60  ;;  %v717_v57 = vlaneseq }
 0x1bf   :  { %v687_v28 = vmax.f32 %v565_v23, 0.0  ;;  %v560_v30 = vadd.f32 %v1611_v60, %v1594_v38  ;;  %v550_v38 = vadd.f32 %v1611_v60, %v1592_v36  ;;  %v683_v36 = vmax.f32 %v545_v35, 0.0 }
 0x1c0   :  { %v1231_v39 = vpop.f32.mrf.mxu1  ;;  %vm912_vm2 = vcmp.lt.s32.totalorder %v717_v57, 256 }
 0x1c1   :  { %v575_v15 = vadd.f32 %v1231_v39, %v1611_v60 }
 0x1c2   :  { %v569_v40 = vpop.f32.mrf.mxu1 }
 0x1c3   :  { %v689_v19 = vmax.f32 %v575_v15, 0.0  ;;  %v570_v20 = vadd.f32 %v1611_v60, %v569_v40 }
 0x1c4   :  { %v1234_v41 = vpop.f32.mrf.mxu1 }
 0x1c5   :  { %v585_v7 = vadd.f32 %v1234_v41, %v1611_v60  ;;  %v688_v24 = vmax.f32 %v570_v20, 0.0  ;;  %v686_v41 = vmax.f32 %v560_v30, 0.0 }
 0x1c6   :  { %v579_v42 = vpop.f32.mrf.mxu1 }
 0x1c7   :  { %v691_v11 = vmax.f32 %v585_v7, 0.0  ;;  %v580_v12 = vadd.f32 %v1611_v60, %v579_v42  ;;  %v715_v7 = vpop.permute.xlu0 %714 }
 0x1c8   :  { %v1237_v43 = vpop.f32.mrf.mxu1 }
 0x1c9   :  { %v595_v61 = vadd.f32 %v1237_v43, %v1611_v60  ;;  %v690_v16 = vmax.f32 %v580_v12, 0.0 }
 0x1ca   :  { %v589_v44 = vpop.f32.mrf.mxu1 }
 0x1cb   :  { %v693_v3 = vmax.f32 %v595_v61, 0.0  ;;  %v590_v4 = vadd.f32 %v1611_v60, %v589_v44  ;;  %v685_v44 = vmax.f32 %v555_v37, 0.0 }
 0x1cc   :  { %v1596_v45 = vpop.f32.mrf.mxu1 }
 0x1cd   :  { %v692_v8 = vmax.f32 %v590_v4, 0.0 }
 0x1ce   :  { %v1598_v46 = vpop.f32.mrf.mxu1 }
 0x1d0   :  { %v1600_v47 = vpop.f32.mrf.mxu1 }
 0x1d2   :  { %v1602_v48 = vpop.f32.mrf.mxu1 }
 0x1d3   :  { %v610_v61 = vadd.f32 %v1611_v60, %v1602_v48 }
 0x1d4   :  { %v1604_v49 = vpop.f32.mrf.mxu1 }
 0x1d6   :  { %v1606_v50 = vpop.f32.mrf.mxu1 }
 0x1d8   :  { %v1249_v51 = vpop.f32.mrf.mxu1 }
 0x1d9   :  { %v635_v39 = vadd.f32 %v1249_v51, %v1611_v60  ;;  %v625_v51 = vadd.f32 %v1604_v49, %v1611_v60  ;;  %v540_v49 = vadd.f32 %v1611_v60, %v1588_v34  ;;  %v681_v34 = vmax.f32 %v535_v33, 0.0 }
 0x1da   :  { %v629_v52 = vpop.f32.mrf.mxu1 }
 0x1db   :  { %v701_v42 = vmax.f32 %v635_v39, 0.0  ;;  %v630_v43 = vadd.f32 %v1611_v60, %v629_v52  ;;  %v684_v52 = vmax.f32 %v550_v38, 0.0 }
 0x1dc   :  { %v1252_v53 = vpop.f32.mrf.mxu1 }
 0x1dd   :  { %v645_v21 = vadd.f32 %v1252_v53, %v1611_v60  ;;  %v700_v53 = vmax.f32 %v630_v43, 0.0 }
 0x1de   :  { %v639_v54 = vpop.f32.mrf.mxu1 }
 0x1df   :  { %v703_v25 = vmax.f32 %v645_v21, 0.0  ;;  %v640_v26 = vadd.f32 %v1611_v60, %v639_v54  ;;  %v699_v54 = vmax.f32 %v625_v51, 0.0 }
 0x1e0   :  { %v1255_v55 = vpop.f32.mrf.mxu1 }
 0x1e1   :  { %v655_v13 = vadd.f32 %v1255_v55, %v1611_v60  ;;  %v702_v40 = vmax.f32 %v640_v26, 0.0  ;;  %v620_v55 = vadd.f32 %v1611_v60, %v1606_v50  ;;  %v682_v50 = vmax.f32 %v540_v49, 0.0 }
 0x1e2   :  { %v649_v56 = vpop.f32.mrf.mxu1 }
 0x1e3   :  { %v705_v17 = vmax.f32 %v655_v13, 0.0  ;;  %v650_v18 = vadd.f32 %v1611_v60, %v649_v56  ;;  %v615_v56 = vadd.f32 %v1600_v47, %v1611_v60  ;;  %v530_v47 = vadd.f32 %v1611_v60, %v1584_v32 }
 0x1e4   :  { %v1258_v58 = vpop.f32.mrf.mxu1  ;;  %v679_v32 = vmax.f32 %v525_v31, 0.0 }
 0x1e5   :  { %v665_v5 = vadd.f32 %v1258_v58, %v1611_v60  ;;  %v704_v22 = vmax.f32 %v650_v18, 0.0  ;;  %v698_v58 = vmax.f32 %v620_v55, 0.0  ;;  %v680_v48 = vmax.f32 %v530_v47, 0.0 }
 0x1e6   :  { %v659_v59 = vpop.f32.mrf.mxu1 }
 0x1e7   :  { %v707_v9 = vmax.f32 %v665_v5, 0.0  ;;  %v660_v10 = vadd.f32 %v1611_v60, %v659_v59  ;;  %v697_v59 = vmax.f32 %v615_v56, 0.0  ;;  %v1289_v5 = vmov 1966171168  }
 0x1e8   :  { %v1261_v62 = vpop.f32.mrf.mxu1 }
 0x1e9   :  { %v675_v63 = vadd.f32 %v1261_v62, %v1611_v60  ;;  %v706_v14 = vmax.f32 %v660_v10, 0.0  ;;  %v605_v62 = vadd.f32 %v1596_v45, %v1611_v60  ;;  %v520_v45 = vadd.f32 %v1611_v60, %v1580_v29 }
 0x1ea   :  { %v669_v0 = vpop.f32.mrf.mxu1 }
 0x1eb   :  { %v709_v1 = vmax.f32 %v675_v63, 0.0  ;;  %v670_v2 = vadd.f32 %v1611_v60, %v669_v0  ;;  %v696_v63 = vmax.f32 %v610_v61, 0.0  ;;  %v695_v0 = vmax.f32 %v605_v62, 0.0 }
 0x1ed   :  { %v708_v6 = vmax.f32 %v670_v2, 0.0  ;;  %1084 = vmatprep.subr.msk.mxu1 %vm721_vm1, %v709_v1  ;;  %v600_v1 = vadd.f32 %v1611_v60, %v1598_v46  ;;  %v718_v46 = vshrl.u32 %v717_v57, 7 }
 0x1ee   :  { %1085 = vmatpush3.xpose.msk.msra.mxu1 %vm721_vm1, %v693_v3  ;;  %v678_v3 = vmax.f32 %v520_v45, 0.0 }
 0x1ef   :  { %1086 = vmatprep.subr.msk.mxu1 %vm721_vm1, %v708_v6  ;;  %v694_v2 = vmax.f32 %v600_v1, 0.0  ;;  %v719_v4 = vsub.s32 0, %v718_v46  ;;  %v896_v6 = vunpack.c.l.s4 %v1289_v5 }
 0x1f2   :  { %1087 = vmatpush3.xpose.msk.msra.mxu1 %vm721_vm1, %v692_v8  ;;  %v720_v8 = vrot.slane %v715_v7, %v719_v4 }
 0x1f3   :  { %1088 = vmatprep.subr.msk.mxu1 %vm721_vm1, %v707_v9  ;;  %v897_v9 = vunpack.c.0.s8 %v896_v6 }
 0x1f5   :  { %v900_v12 = vsub.s32 %v897_v9, %v718_v46 }
 0x1f6   :  { %1089 = vmatpush3.xpose.msk.msra.mxu1 %vm721_vm1, %v691_v11 }
 0x1f7   :  { %1090 = vmatprep.subr.msk.mxu1 %vm721_vm1, %v706_v14 }
 0x1fa   :  { %1091 = vmatpush3.xpose.msk.msra.mxu1 %vm721_vm1, %v690_v16 }
 0x1fb   :  { %1092 = vmatprep.subr.msk.mxu1 %vm721_vm1, %v705_v17 }
 0x1fe   :  { %1093 = vmatpush3.xpose.msk.msra.mxu1 %vm721_vm1, %v689_v19 }
 0x1ff   :  { %1094 = vmatprep.subr.msk.mxu1 %vm721_vm1, %v704_v22 }
 0x202   :  { %1095 = vmatpush3.xpose.msk.msra.mxu1 %vm721_vm1, %v688_v24 }
 0x203   :  { %1096 = vmatprep.subr.msk.mxu1 %vm721_vm1, %v703_v25 }
 0x206   :  { %1097 = vmatpush3.xpose.msk.msra.mxu1 %vm721_vm1, %v687_v28 }
 0x207   :  { %1098 = vmatprep.subr.msk.mxu1 %vm721_vm1, %v702_v40 }
 0x20a   :  { %1099 = vmatpush3.xpose.msk.msra.mxu1 %vm721_vm1, %v686_v41 }
 0x20b   :  { %1100 = vmatprep.subr.msk.mxu1 %vm721_vm1, %v701_v42 }
 0x20e   :  { %1101 = vmatpush3.xpose.msk.msra.mxu1 %vm721_vm1, %v685_v44 }
 0x20f   :  { %1102 = vmatprep.subr.msk.mxu1 %vm721_vm1, %v700_v53 }
 0x212   :  { %1103 = vmatpush3.xpose.msk.msra.mxu1 %vm721_vm1, %v684_v52 }
 0x213   :  { %1104 = vmatprep.subr.msk.mxu1 %vm721_vm1, %v699_v54 }
 0x216   :  { %1105 = vmatpush3.xpose.msk.msra.mxu1 %vm721_vm1, %v683_v36 }
 0x217   :  { %1106 = vmatprep.subr.msk.mxu1 %vm721_vm1, %v698_v58 }
 0x21a   :  { %1107 = vmatpush3.xpose.msk.msra.mxu1 %vm721_vm1, %v682_v50 }
 0x21b   :  { %1108 = vmatprep.subr.msk.mxu1 %vm721_vm1, %v697_v59 }
 0x21e   :  { %1109 = vmatpush3.xpose.msk.msra.mxu1 %vm721_vm1, %v681_v34 }
 0x21f   :  { %1110 = vmatprep.subr.msk.mxu1 %vm721_vm1, %v696_v63 }
 0x222   :  { %1111 = vmatpush3.xpose.msk.msra.mxu1 %vm721_vm1, %v680_v48 }
 0x223   :  { %1112 = vmatprep.subr.msk.mxu1 %vm721_vm1, %v695_v0 }
 0x226   :  { %1113 = vmatpush3.xpose.msk.msra.mxu1 %vm721_vm1, %v679_v32 }
 0x227   :  { %1114 = vmatprep.subr.msk.mxu1 %vm721_vm1, %v694_v2 }
 0x22a   :  { %1115 = vmatpush3.xpose.msk.msra.mxu1 %vm721_vm1, %v678_v3 }
 0x22d   :  { %1117 = vmatmul.mubr.msk.f32.vlgmr.msra.gmra.mxu1 %vm721_vm1, %v1574_v27 }
 0x2ed   :  { %v887_v29 = vpop.f32.mrf.mxu1 }
 0x2ee   :  { %v888_v10 = vadd.f32 %v887_v29, %v720_v8 }
 0x2ef   :  { %v889_v60 = vpop.f32.mrf.mxu1 }
 0x2f0   :  { %v890_v11 = vadd.f32 %v889_v60, %v720_v8 }
 0x2f2   :  { %v894_v13 = vcombine.low %v888_v10, %v890_v11 }
 0x2f4   :  { %v901_v14 = vrot.slane %v894_v13, %v900_v12 }
 0x2f6   :  { %v908_v15 = vrot.slane %v901_v14, %v900_v12 }
 0x2f8   :  { %914 = vst.msk [vmem:[#allocation3] sm:$0x3] %vm912_vm2, %v908_v15 }
 0x2f9   :  { %1277 = shalt.err (!%p1274_p4)
}
 0x2fa   :  { %924 = dma.vmem_to_hbm [thread:$0]  %s922_s17, 32, %s1704_s7, [#allocation4]  }
 0x2fb   :  { %1286 = dma.done.wait [#allocation4], 32  }
 0x2fc   :  { %1287 = vsyncadd [#allocation4], 4294967264 }
 0x2fd   :  { %928 = vsyncpa [#allocation4], 1 }

</bundles_post_ra>
